<compile_context>
chip_gen: v7x
topology: tpu7x:2x2x1
jax: 0.10.0
libtpu: 0.0.40
codegen_flags: <defaults>
</compile_context>

<pallas_src>
import functools

import jax
import jax.numpy as jnp
from jax.experimental import pallas as pl
from jax.experimental.pallas import tpu as pltpu


# ------------------------------ small helpers ---------------------------------

def _row_tile(m):
    """Largest tile in {512,...,8} dividing m (falls back to m itself)."""
    for t in (512, 256, 128, 64, 32, 16, 8):
        if m % t == 0:
            return t
    return m


def _vmem_limit_bytes():
    """Per-generation scoped-VMEM limit: 3/4 of physical, capped at 100 MiB."""
    try:
        cap = pltpu.get_tpu_info().vmem_capacity_bytes
        return int(min(cap * 3 // 4, 100 * 1024 * 1024))
    except Exception:
        return 64 * 1024 * 1024


def _eup_supports_bf16():
    """bf16 transcendentals exist on v6e/v7x, not on v5e and older."""
    try:
        kind = jax.devices()[0].device_kind.lower()
    except Exception:
        return False
    return not any(t in kind for t in ("v2", "v3", "v4", "v5"))


# ----------------- kernel 1: fused per-(batch, head) QKV + attention ----------

def _qkv_attention_kernel(xq_ref, xk_ref, xv_ref, wq_ref, wk_ref, wv_ref,
                          *refs, scale, has_bias, return_attn, exp_bf16):
    i = 0
    bias_ref = None
    if has_bias:
        bias_ref = refs[i]
        i += 1
    ctx_ref = refs[i]
    attn_ref = refs[i + 1] if return_attn else None

    xq = xq_ref[0].astype(jnp.bfloat16)        # (Lq, D)  (f32 input, residual)
    xk = xk_ref[0]                             # (Lk, D)  bf16
    xv = xv_ref[0]                             # (Lk, D)  bf16
    wq = wq_ref[0]                             # (D, dk)  bf16
    wk = wk_ref[0]                             # (D, dk)  bf16
    wv = wv_ref[0]                             # (D, dv)  bf16

    # Per-head projections (MXU, f32 accumulation); 1/sqrt(d_k) applied in f32.
    q = (jnp.dot(xq, wq, preferred_element_type=jnp.float32) * scale
         ).astype(jnp.bfloat16)                                    # (Lq, dk)
    k = jnp.dot(xk, wk, preferred_element_type=jnp.float32
                ).astype(jnp.bfloat16)                             # (Lk, dk)
    v = jnp.dot(xv, wv, preferred_element_type=jnp.float32
                ).astype(jnp.bfloat16)                             # (Lk, dv)

    scores = jnp.dot(q, k.T, preferred_element_type=jnp.float32)   # (Lq, Lk) f32
    if has_bias:
        scores = scores + bias_ref[0]          # additive mask bias, f32

    # Softmax over keys: max/sum in f32; exponent optionally in bf16 (EUP).
    m = jnp.max(scores, axis=-1, keepdims=True)
    s = scores - m
    if exp_bf16:
        p = jnp.exp(s.astype(jnp.bfloat16))
        l = jnp.sum(p.astype(jnp.float32), axis=-1, keepdims=True)
    else:
        p = jnp.exp(s)
        l = jnp.sum(p, axis=-1, keepdims=True)

    if return_attn:
        attn = p.astype(jnp.float32) / l       # exact normalization
        attn_ref[0, 0] = attn.astype(attn_ref.dtype)
        ctx = jnp.dot(attn.astype(jnp.bfloat16), v,
                      preferred_element_type=jnp.float32)
    else:
        ctx = jnp.dot(p.astype(jnp.bfloat16), v,
                      preferred_element_type=jnp.float32)
        ctx = ctx * pl.reciprocal(l, approx=True)   # normalize (Lq, dv) not (Lq, Lk)

    ctx_ref[0, 0] = ctx.astype(ctx_ref.dtype)


# --------- kernel 2: output projection (head reduction) + residual + LN -------

def _out_proj_ln_kernel(ctx_ref, wfc_ref, res_ref, g_ref, b_ref, o_ref,
                        acc_ref, *, eps):
    h = pl.program_id(2)

    @pl.when(h == 0)
    def _():
        acc_ref[...] = jnp.zeros_like(acc_ref)

    # Accumulate this head's contribution of the fc projection.
    acc_ref[...] += jnp.dot(ctx_ref[0, 0], wfc_ref[0],
                            preferred_element_type=jnp.float32)

    @pl.when(h == pl.num_programs(2) - 1)
    def _():
        y = acc_ref[...] + res_ref[0]                       # residual, f32
        mean = jnp.mean(y, axis=-1, keepdims=True)
        var = jnp.mean(jnp.square(y - mean), axis=-1, keepdims=True)
        y = (y - mean) * jax.lax.rsqrt(var + eps)
        o_ref[0] = (y * g_ref[...] + b_ref[...]).astype(o_ref.dtype)


# ----------------------------- full MHA forward --------------------------------

@functools.partial(jax.jit,
                   static_argnames=("n_head", "d_k", "d_v", "return_attn"))
def multi_head_attention(q, k, v, w_q, w_k, w_v, w_fc, ln_g, ln_b, mask=None,
                         *, n_head, d_k, d_v, return_attn=False):
    """Forward pass of the PyTorch MultiHeadAttention module (eval mode).

    q: (B, Lq, D); k, v: (B, Lk, D).  Weights are stored (in_features,
    out_features) so y = x @ W.  mask: None, (B, Lk), (B, 1, Lk) or
    (B, Lq, Lk) with 1 = keep / 0 = mask.  Returns (out (B, Lq, D) f32,
    attn (B, H, Lq, Lk) bf16 or None).
    """
    B, Lq, D = q.shape
    Lk = k.shape[1]
    H = n_head
    scale = 1.0 / (d_k ** 0.5)

    vmem_limit = _vmem_limit_bytes()
    exp_bf16 = (not return_attn) and _eup_supports_bf16()

    # Per-head weight views (tiny, one-time parameter layout change).
    wq_h = w_q.reshape(D, H, d_k).transpose(1, 0, 2).astype(jnp.bfloat16)
    wk_h = w_k.reshape(D, H, d_k).transpose(1, 0, 2).astype(jnp.bfloat16)
    wv_h = w_v.reshape(D, H, d_v).transpose(1, 0, 2).astype(jnp.bfloat16)
    wfc_h = w_fc.reshape(H, d_v, D).astype(jnp.bfloat16)

    q_f32 = q.astype(jnp.float32)              # also the residual stream
    k_bf = k.astype(jnp.bfloat16)
    v_bf = v.astype(jnp.bfloat16)

    # Mask -> precomputed additive bias; the unmasked path carries no stream.
    bias = None
    if mask is not None:
        m3 = mask if mask.ndim == 3 else mask[:, None, :]
        bias = jnp.where(m3 == 0, -1e9, 0.0).astype(jnp.float32)

    # ---- kernel 1: fused per-(batch, head) QKV projection + attention ----
    in_specs = [
        pl.BlockSpec((1, Lq, D), lambda b, h: (b, 0, 0)),
        pl.BlockSpec((1, Lk, D), lambda b, h: (b, 0, 0)),
        pl.BlockSpec((1, Lk, D), lambda b, h: (b, 0, 0)),
        pl.BlockSpec((1, D, d_k), lambda b, h: (h, 0, 0)),
        pl.BlockSpec((1, D, d_k), lambda b, h: (h, 0, 0)),
        pl.BlockSpec((1, D, d_v), lambda b, h: (h, 0, 0)),
    ]
    inputs = [q_f32, k_bf, v_bf, wq_h, wk_h, wv_h]
    if bias is not None:
        Lm = bias.shape[1]
        in_specs.append(pl.BlockSpec((1, Lm, Lk), lambda b, h: (b, 0, 0)))
        inputs.append(bias)

    ctx_shape = jax.ShapeDtypeStruct((B, H, Lq, d_v), jnp.bfloat16)
    ctx_spec = pl.BlockSpec((1, 1, Lq, d_v), lambda b, h: (b, h, 0, 0))
    if return_attn:
        out_shape = (ctx_shape,
                     jax.ShapeDtypeStruct((B, H, Lq, Lk), jnp.bfloat16))
        out_specs = (ctx_spec,
                     pl.BlockSpec((1, 1, Lq, Lk), lambda b, h: (b, h, 0, 0)))
    else:
        out_shape = ctx_shape
        out_specs = ctx_spec

    attn_kernel = functools.partial(
        _qkv_attention_kernel, scale=scale, has_bias=bias is not None,
        return_attn=return_attn, exp_bf16=exp_bf16)

    result = pl.pallas_call(
        attn_kernel,
        out_shape=out_shape,
        grid=(B, H),
        in_specs=in_specs,
        out_specs=out_specs,
        compiler_params=pltpu.CompilerParams(
            dimension_semantics=("parallel", "parallel"),
            vmem_limit_bytes=vmem_limit),
    )(*inputs)
    if return_attn:
        ctx, attn = result
    else:
        ctx, attn = result, None

    # ---- kernel 2: output projection (head reduction) + residual + LN ----
    g2 = ln_g.reshape(1, D).astype(jnp.float32)
    b2 = ln_b.reshape(1, D).astype(jnp.float32)
    tl = _row_tile(Lq)

    out = pl.pallas_call(
        functools.partial(_out_proj_ln_kernel, eps=1e-6),
        out_shape=jax.ShapeDtypeStruct((B, Lq, D), jnp.float32),
        grid=(B, Lq // tl, H),
        in_specs=[
            pl.BlockSpec((1, 1, tl, d_v), lambda b, i, h: (b, h, i, 0)),
            pl.BlockSpec((1, d_v, D), lambda b, i, h: (h, 0, 0)),
            pl.BlockSpec((1, tl, D), lambda b, i, h: (b, i, 0)),
            pl.BlockSpec((1, D), lambda b, i, h: (0, 0)),
            pl.BlockSpec((1, D), lambda b, i, h: (0, 0)),
        ],
        out_specs=pl.BlockSpec((1, tl, D), lambda b, i, h: (b, i, 0)),
        scratch_shapes=[pltpu.VMEM((tl, D), jnp.float32)],
        compiler_params=pltpu.CompilerParams(
            dimension_semantics=("parallel", "parallel", "arbitrary"),
            vmem_limit_bytes=vmem_limit),
    )(ctx, wfc_h, q_f32, g2, b2)

    return out, attn


# ----------------------------- pure-JAX reference ------------------------------

def _reference_mha(q, k, v, w_q, w_k, w_v, w_fc, ln_g, ln_b, mask,
                   n_head, d_k, d_v):
    B, Lq, D = q.shape
    Lk = k.shape[1]
    qp = (q @ w_q).reshape(B, Lq, n_head, d_k).transpose(0, 2, 1, 3)
    kp = (k @ w_k).reshape(B, Lk, n_head, d_k).transpose(0, 2, 1, 3)
    vp = (v @ w_v).reshape(B, Lk, n_head, d_v).transpose(0, 2, 1, 3)
    scores = jnp.einsum("bhqd,bhkd->bhqk", qp / (d_k ** 0.5), kp)
    if mask is not None:
        m3 = mask if mask.ndim == 3 else mask[:, None, :]
        scores = jnp.where(m3[:, None] == 0, -1e9, scores)
    attn = jax.nn.softmax(scores, axis=-1)
    ctx = jnp.einsum("bhqk,bhkd->bhqd", attn, vp)
    ctx = ctx.transpose(0, 2, 1, 3).reshape(B, Lq, n_head * d_v)
    y = ctx @ w_fc + q
    mean = y.mean(-1, keepdims=True)
    var = ((y - mean) ** 2).mean(-1, keepdims=True)
    y = (y - mean) / jnp.sqrt(var + 1e-6)
    return y * ln_g.reshape(1, 1, D) + ln_b.reshape(1, 1, D), attn


# ----------------------------- demo --------------------------------------------

if __name__ == "__main__":
    B, L = 2, 8
    d_model = 32
    n_head, d_k, d_v = 2, 16, 16

    key = jax.random.PRNGKey(0)
    kx, kq, kk, kv, kf = jax.random.split(key, 5)
    x = jax.random.normal(kx, (B, L, d_model), jnp.float32)
    w_q = 0.05 * jax.random.normal(kq, (d_model, n_head * d_k), jnp.float32)
    w_k = 0.05 * jax.random.normal(kk, (d_model, n_head * d_k), jnp.float32)
    w_v = 0.05 * jax.random.normal(kv, (d_model, n_head * d_v), jnp.float32)
    w_fc = 0.05 * jax.random.normal(kf, (n_head * d_v, d_model), jnp.float32)
    ln_g = jnp.ones((1, d_model), jnp.float32)
    ln_b = jnp.zeros((1, d_model), jnp.float32)

    # Padding mask: last key position of batch 1 masked out.
    mask = jnp.ones((B, 1, L), jnp.float32).at[1, 0, -1].set(0.0)

    # Masked path, with attention probabilities returned (exact softmax path).
    out, attn = multi_head_attention(x, x, x, w_q, w_k, w_v, w_fc, ln_g, ln_b,
                                     mask=mask, n_head=n_head, d_k=d_k,
                                     d_v=d_v, return_attn=True)
    out = jax.block_until_ready(out)
    attn = jax.block_until_ready(attn)
    assert out.shape == (B, L, d_model)
    assert attn.shape == (B, n_head, L, L)
    assert bool(jnp.all(jnp.isfinite(out)))
    assert bool(jnp.all(jnp.isfinite(attn.astype(jnp.float32))))

    # Fast path: no mask, no attention-prob writeback.
    out2, attn2 = multi_head_attention(x, x, x, w_q, w_k, w_v, w_fc, ln_g,
                                       ln_b, mask=None, n_head=n_head,
                                       d_k=d_k, d_v=d_v, return_attn=False)
    out2 = jax.block_until_ready(out2)
    assert attn2 is None and out2.shape == (B, L, d_model)
    assert bool(jnp.all(jnp.isfinite(out2)))

    # Tolerance check against a pure-JAX f32 reference (masked/exact path).
    ref_out, ref_attn = _reference_mha(x, x, x, w_q, w_k, w_v, w_fc, ln_g,
                                       ln_b, mask, n_head, d_k, d_v)
    max_out_err = float(jnp.max(jnp.abs(out - ref_out)))
    max_attn_err = float(jnp.max(jnp.abs(attn.astype(jnp.float32) - ref_attn)))
    assert max_out_err < 5e-2, f"out err {max_out_err}"
    assert max_attn_err < 2e-2, f"attn err {max_attn_err}"

    print("KERNEL_OK")
</pallas_src>

<mosaic_0001>
module attributes {stable_mosaic.version = 11 : i64} {
  func.func @_qkv_attention_kernel(%arg0: i32, %arg1: i32, %arg2: memref<1x8x32xf32, #tpu.memory_space<vmem>>, %arg3: memref<1x8x32xbf16, #tpu.memory_space<vmem>>, %arg4: memref<1x8x32xbf16, #tpu.memory_space<vmem>>, %arg5: memref<1x32x16xbf16, #tpu.memory_space<vmem>>, %arg6: memref<1x32x16xbf16, #tpu.memory_space<vmem>>, %arg7: memref<1x32x16xbf16, #tpu.memory_space<vmem>>, %arg8: memref<1x1x8xf32, #tpu.memory_space<vmem>>, %arg9: memref<1x1x8x16xbf16, #tpu.memory_space<vmem>>, %arg10: memref<1x1x8x8xbf16, #tpu.memory_space<vmem>>) attributes {dimension_semantics = [#tpu.dimension_semantics<parallel>, #tpu.dimension_semantics<parallel>], iteration_bounds = array<i64: 2, 2>, scalar_prefetch = 0 : i64, scratch_operands = 0 : i64, tpu.core_type = #tpu.core_type<tc>, window_params = [{transform_indices = @transform_0, window_bounds = array<i64: 1, 8, 32>}, {transform_indices = @transform_1, window_bounds = array<i64: 1, 8, 32>}, {transform_indices = @transform_2, window_bounds = array<i64: 1, 8, 32>}, {transform_indices = @transform_3, window_bounds = array<i64: 1, 32, 16>}, {transform_indices = @transform_4, window_bounds = array<i64: 1, 32, 16>}, {transform_indices = @transform_5, window_bounds = array<i64: 1, 32, 16>}, {transform_indices = @transform_6, window_bounds = array<i64: 1, 1, 8>}, {transform_indices = @transform_7, window_bounds = array<i64: 1, 1, 8, 16>}, {transform_indices = @transform_8, window_bounds = array<i64: 1, 1, 8, 8>}]} {
    %c0 = arith.constant 0 : index
    %c0_0 = arith.constant 0 : index
    %c0_1 = arith.constant 0 : index
    %0 = vector.load %arg2[%c0, %c0_0, %c0_1] : memref<1x8x32xf32, #tpu.memory_space<vmem>>, vector<1x8x32xf32>
    %1 = vector.shape_cast %0 : vector<1x8x32xf32> to vector<8x32xf32>
    %2 = arith.truncf %1 : vector<8x32xf32> to vector<8x32xbf16>
    %c0_2 = arith.constant 0 : index
    %c0_3 = arith.constant 0 : index
    %c0_4 = arith.constant 0 : index
    %3 = vector.load %arg3[%c0_2, %c0_3, %c0_4] : memref<1x8x32xbf16, #tpu.memory_space<vmem>>, vector<1x8x32xbf16>
    %4 = vector.shape_cast %3 : vector<1x8x32xbf16> to vector<8x32xbf16>
    %c0_5 = arith.constant 0 : index
    %c0_6 = arith.constant 0 : index
    %c0_7 = arith.constant 0 : index
    %5 = vector.load %arg4[%c0_5, %c0_6, %c0_7] : memref<1x8x32xbf16, #tpu.memory_space<vmem>>, vector<1x8x32xbf16>
    %6 = vector.shape_cast %5 : vector<1x8x32xbf16> to vector<8x32xbf16>
    %c0_8 = arith.constant 0 : index
    %c0_9 = arith.constant 0 : index
    %c0_10 = arith.constant 0 : index
    %7 = vector.load %arg5[%c0_8, %c0_9, %c0_10] : memref<1x32x16xbf16, #tpu.memory_space<vmem>>, vector<1x32x16xbf16>
    %8 = vector.shape_cast %7 : vector<1x32x16xbf16> to vector<32x16xbf16>
    %c0_11 = arith.constant 0 : index
    %c0_12 = arith.constant 0 : index
    %c0_13 = arith.constant 0 : index
    %9 = vector.load %arg6[%c0_11, %c0_12, %c0_13] : memref<1x32x16xbf16, #tpu.memory_space<vmem>>, vector<1x32x16xbf16>
    %10 = vector.shape_cast %9 : vector<1x32x16xbf16> to vector<32x16xbf16>
    %c0_14 = arith.constant 0 : index
    %c0_15 = arith.constant 0 : index
    %c0_16 = arith.constant 0 : index
    %11 = vector.load %arg7[%c0_14, %c0_15, %c0_16] : memref<1x32x16xbf16, #tpu.memory_space<vmem>>, vector<1x32x16xbf16>
    %12 = vector.shape_cast %11 : vector<1x32x16xbf16> to vector<32x16xbf16>
    %cst = arith.constant dense<0.000000e+00> : vector<8x16xf32>
    %13 = tpu.matmul %2, %8, %cst {dimension_numbers = #tpu.dot_dimension_numbers<[1], [0], [0], [1], [0, 0, 1, 1], [], []>} : vector<8x32xbf16>, vector<32x16xbf16>, vector<8x16xf32> -> vector<8x16xf32>
    %cst_17 = arith.constant 2.500000e-01 : f32
    %14 = vector.broadcast %cst_17 : f32 to vector<8x16xf32>
    %15 = arith.mulf %13, %14 : vector<8x16xf32>
    %16 = arith.truncf %15 : vector<8x16xf32> to vector<8x16xbf16>
    %cst_18 = arith.constant dense<0.000000e+00> : vector<8x16xf32>
    %17 = tpu.matmul %4, %10, %cst_18 {dimension_numbers = #tpu.dot_dimension_numbers<[1], [0], [0], [1], [0, 0, 1, 1], [], []>} : vector<8x32xbf16>, vector<32x16xbf16>, vector<8x16xf32> -> vector<8x16xf32>
    %18 = arith.truncf %17 : vector<8x16xf32> to vector<8x16xbf16>
    %cst_19 = arith.constant dense<0.000000e+00> : vector<8x16xf32>
    %19 = tpu.matmul %6, %12, %cst_19 {dimension_numbers = #tpu.dot_dimension_numbers<[1], [0], [0], [1], [0, 0, 1, 1], [], []>} : vector<8x32xbf16>, vector<32x16xbf16>, vector<8x16xf32> -> vector<8x16xf32>
    %20 = arith.truncf %19 : vector<8x16xf32> to vector<8x16xbf16>
    %21 = tpu.transpose %18, [1, 0] : vector<8x16xbf16> -> vector<16x8xbf16>
    %cst_20 = arith.constant dense<0.000000e+00> : vector<8x8xf32>
    %22 = tpu.matmul %16, %21, %cst_20 {dimension_numbers = #tpu.dot_dimension_numbers<[1], [0], [0], [1], [0, 0, 1, 1], [], []>} : vector<8x16xbf16>, vector<16x8xbf16>, vector<8x8xf32> -> vector<8x8xf32>
    %c0_21 = arith.constant 0 : index
    %c0_22 = arith.constant 0 : index
    %c0_23 = arith.constant 0 : index
    %23 = vector.load %arg8[%c0_21, %c0_22, %c0_23] : memref<1x1x8xf32, #tpu.memory_space<vmem>>, vector<1x1x8xf32>
    %24 = vector.shape_cast %23 : vector<1x1x8xf32> to vector<1x8xf32>
    %25 = vector.broadcast %24 : vector<1x8xf32> to vector<8x8xf32>
    %26 = arith.addf %22, %25 : vector<8x8xf32>
    %cst_24 = arith.constant dense<0xFF800000> : vector<8xf32>
    %27 = vector.multi_reduction <maximumf>, %26, %cst_24 [1] : vector<8x8xf32> to vector<8xf32>
    %28 = vector.shape_cast %27 : vector<8xf32> to vector<8x1xf32>
    %29 = vector.broadcast %28 : vector<8x1xf32> to vector<8x8xf32>
    %30 = arith.subf %26, %29 : vector<8x8xf32>
    %31 = math.exp %30 : vector<8x8xf32>
    %cst_25 = arith.constant dense<0.000000e+00> : vector<8xf32>
    %32 = vector.multi_reduction <add>, %31, %cst_25 [1] : vector<8x8xf32> to vector<8xf32>
    %33 = vector.shape_cast %32 : vector<8xf32> to vector<8x1xf32>
    %34 = vector.broadcast %33 : vector<8x1xf32> to vector<8x8xf32>
    %35 = arith.divf %31, %34 : vector<8x8xf32>
    %36 = arith.truncf %35 : vector<8x8xf32> to vector<8x8xbf16>
    %c0_26 = arith.constant 0 : index
    %c0_27 = arith.constant 0 : index
    %c0_28 = arith.constant 0 : index
    %c0_29 = arith.constant 0 : index
    %37 = vector.load %arg10[%c0_26, %c0_27, %c0_28, %c0_29] : memref<1x1x8x8xbf16, #tpu.memory_space<vmem>>, vector<1x1x8x8xbf16>
    %38 = vector.shape_cast %37 : vector<1x1x8x8xbf16> to vector<8x8xbf16>
    %39 = vector.shape_cast %36 : vector<8x8xbf16> to vector<1x1x8x8xbf16>
    tpu.vector_store %arg10[%c0_26, %c0_27, %c0_28, %c0_29], %39 {strides = array<i32>} : memref<1x1x8x8xbf16, #tpu.memory_space<vmem>>, vector<1x1x8x8xbf16>,
    %40 = arith.truncf %35 : vector<8x8xf32> to vector<8x8xbf16>
    %cst_30 = arith.constant dense<0.000000e+00> : vector<8x16xf32>
    %41 = tpu.matmul %40, %20, %cst_30 {dimension_numbers = #tpu.dot_dimension_numbers<[1], [0], [0], [1], [0, 0, 1, 1], [], []>} : vector<8x8xbf16>, vector<8x16xbf16>, vector<8x16xf32> -> vector<8x16xf32>
    %42 = arith.truncf %41 : vector<8x16xf32> to vector<8x16xbf16>
    %c0_31 = arith.constant 0 : index
    %c0_32 = arith.constant 0 : index
    %c0_33 = arith.constant 0 : index
    %c0_34 = arith.constant 0 : index
    %43 = vector.load %arg9[%c0_31, %c0_32, %c0_33, %c0_34] : memref<1x1x8x16xbf16, #tpu.memory_space<vmem>>, vector<1x1x8x16xbf16>
    %44 = vector.shape_cast %43 : vector<1x1x8x16xbf16> to vector<8x16xbf16>
    %45 = vector.shape_cast %42 : vector<8x16xbf16> to vector<1x1x8x16xbf16>
    tpu.vector_store %arg9[%c0_31, %c0_32, %c0_33, %c0_34], %45 {strides = array<i32>} : memref<1x1x8x16xbf16, #tpu.memory_space<vmem>>, vector<1x1x8x16xbf16>,
    return
  }
  func.func @transform_0(%arg0: i32, %arg1: i32) -> (i32, i32, i32) {
    %c0_i32 = arith.constant 0 : i32
    %c0_i32_0 = arith.constant 0 : i32
    %c0_i32_1 = arith.constant 0 : i32
    return %arg0, %c0_i32, %c0_i32_0 : i32, i32, i32
  }
  func.func @transform_1(%arg0: i32, %arg1: i32) -> (i32, i32, i32) {
    %c0_i32 = arith.constant 0 : i32
    %c0_i32_0 = arith.constant 0 : i32
    %c0_i32_1 = arith.constant 0 : i32
    return %arg0, %c0_i32, %c0_i32_0 : i32, i32, i32
  }
  func.func @transform_2(%arg0: i32, %arg1: i32) -> (i32, i32, i32) {
    %c0_i32 = arith.constant 0 : i32
    %c0_i32_0 = arith.constant 0 : i32
    %c0_i32_1 = arith.constant 0 : i32
    return %arg0, %c0_i32, %c0_i32_0 : i32, i32, i32
  }
  func.func @transform_3(%arg0: i32, %arg1: i32) -> (i32, i32, i32) {
    %c0_i32 = arith.constant 0 : i32
    %c0_i32_0 = arith.constant 0 : i32
    %c0_i32_1 = arith.constant 0 : i32
    return %arg1, %c0_i32, %c0_i32_0 : i32, i32, i32
  }
  func.func @transform_4(%arg0: i32, %arg1: i32) -> (i32, i32, i32) {
    %c0_i32 = arith.constant 0 : i32
    %c0_i32_0 = arith.constant 0 : i32
    %c0_i32_1 = arith.constant 0 : i32
    return %arg1, %c0_i32, %c0_i32_0 : i32, i32, i32
  }
  func.func @transform_5(%arg0: i32, %arg1: i32) -> (i32, i32, i32) {
    %c0_i32 = arith.constant 0 : i32
    %c0_i32_0 = arith.constant 0 : i32
    %c0_i32_1 = arith.constant 0 : i32
    return %arg1, %c0_i32, %c0_i32_0 : i32, i32, i32
  }
  func.func @transform_6(%arg0: i32, %arg1: i32) -> (i32, i32, i32) {
    %c0_i32 = arith.constant 0 : i32
    %c0_i32_0 = arith.constant 0 : i32
    %c0_i32_1 = arith.constant 0 : i32
    return %arg0, %c0_i32, %c0_i32_0 : i32, i32, i32
  }
  func.func @transform_7(%arg0: i32, %arg1: i32) -> (i32, i32, i32, i32) {
    %c0_i32 = arith.constant 0 : i32
    %c0_i32_0 = arith.constant 0 : i32
    %c0_i32_1 = arith.constant 0 : i32
    return %arg0, %arg1, %c0_i32, %c0_i32_0 : i32, i32, i32, i32
  }
  func.func @transform_8(%arg0: i32, %arg1: i32) -> (i32, i32, i32, i32) {
    %c0_i32 = arith.constant 0 : i32
    %c0_i32_0 = arith.constant 0 : i32
    %c0_i32_1 = arith.constant 0 : i32
    return %arg0, %arg1, %c0_i32, %c0_i32_0 : i32, i32, i32, i32
  }
}

module attributes {stable_mosaic.version = 11 : i64} {
  func.func @_out_proj_ln_kernel(%arg0: i32, %arg1: i32, %arg2: i32, %arg3: memref<1x1x8x16xbf16, #tpu.memory_space<vmem>>, %arg4: memref<1x16x32xbf16, #tpu.memory_space<vmem>>, %arg5: memref<1x8x32xf32, #tpu.memory_space<vmem>>, %arg6: memref<1x32xf32, #tpu.memory_space<vmem>>, %arg7: memref<1x32xf32, #tpu.memory_space<vmem>>, %arg8: memref<1x8x32xf32, #tpu.memory_space<vmem>>, %arg9: memref<8x32xf32, #tpu.memory_space<vmem>>) attributes {dimension_semantics = [#tpu.dimension_semantics<parallel>, #tpu.dimension_semantics<parallel>, #tpu.dimension_semantics<arbitrary>], iteration_bounds = array<i64: 2, 1, 2>, scalar_prefetch = 0 : i64, scratch_operands = 1 : i64, tpu.core_type = #tpu.core_type<tc>, window_params = [{transform_indices = @transform_0, window_bounds = array<i64: 1, 1, 8, 16>}, {transform_indices = @transform_1, window_bounds = array<i64: 1, 16, 32>}, {transform_indices = @transform_2, window_bounds = array<i64: 1, 8, 32>}, {pipeline_mode = #tpu.pipeline_mode<synchronous>, transform_indices = @transform_3, window_bounds = array<i64: 1, 32>}, {pipeline_mode = #tpu.pipeline_mode<synchronous>, transform_indices = @transform_4, window_bounds = array<i64: 1, 32>}, {transform_indices = @transform_5, window_bounds = array<i64: 1, 8, 32>}]} {
    %c0_i32 = arith.constant 0 : i32
    %0 = arith.cmpi eq, %arg2, %c0_i32 : i32
    %1 = arith.extui %0 : i1 to i32
    %c0_i32_0 = arith.constant 0 : i32
    %2 = arith.cmpi ne, %1, %c0_i32_0 : i32
    scf.if %2 {
      %cst_12 = arith.constant 0.000000e+00 : f32
      %14 = vector.broadcast %cst_12 : f32 to vector<8x32xf32>
      %c0_13 = arith.constant 0 : index
      %c0_14 = arith.constant 0 : index
      %15 = vector.load %arg9[%c0_13, %c0_14] : memref<8x32xf32, #tpu.memory_space<vmem>>, vector<8x32xf32>
      tpu.vector_store %arg9[%c0_13, %c0_14], %14 {strides = array<i32>} : memref<8x32xf32, #tpu.memory_space<vmem>>, vector<8x32xf32>,
    } else {
    }
    %c0 = arith.constant 0 : index
    %c0_1 = arith.constant 0 : index
    %3 = vector.load %arg9[%c0, %c0_1] : memref<8x32xf32, #tpu.memory_space<vmem>>, vector<8x32xf32>
    %c0_2 = arith.constant 0 : index
    %c0_3 = arith.constant 0 : index
    %c0_4 = arith.constant 0 : index
    %c0_5 = arith.constant 0 : index
    %4 = vector.load %arg3[%c0_2, %c0_3, %c0_4, %c0_5] : memref<1x1x8x16xbf16, #tpu.memory_space<vmem>>, vector<1x1x8x16xbf16>
    %5 = vector.shape_cast %4 : vector<1x1x8x16xbf16> to vector<8x16xbf16>
    %c0_6 = arith.constant 0 : index
    %c0_7 = arith.constant 0 : index
    %c0_8 = arith.constant 0 : index
    %6 = vector.load %arg4[%c0_6, %c0_7, %c0_8] : memref<1x16x32xbf16, #tpu.memory_space<vmem>>, vector<1x16x32xbf16>
    %7 = vector.shape_cast %6 : vector<1x16x32xbf16> to vector<16x32xbf16>
    %cst = arith.constant dense<0.000000e+00> : vector<8x32xf32>
    %8 = tpu.matmul %5, %7, %cst {dimension_numbers = #tpu.dot_dimension_numbers<[1], [0], [0], [1], [0, 0, 1, 1], [], []>} : vector<8x16xbf16>, vector<16x32xbf16>, vector<8x32xf32> -> vector<8x32xf32>
    %9 = arith.addf %3, %8 : vector<8x32xf32>
    %c0_9 = arith.constant 0 : index
    %c0_10 = arith.constant 0 : index
    %10 = vector.load %arg9[%c0_9, %c0_10] : memref<8x32xf32, #tpu.memory_space<vmem>>, vector<8x32xf32>
    tpu.vector_store %arg9[%c0_9, %c0_10], %9 {strides = array<i32>} : memref<8x32xf32, #tpu.memory_space<vmem>>, vector<8x32xf32>,
    %c1_i32 = arith.constant 1 : i32
    %11 = arith.cmpi eq, %arg2, %c1_i32 : i32
    %12 = arith.extui %11 : i1 to i32
    %c0_i32_11 = arith.constant 0 : i32
    %13 = arith.cmpi ne, %12, %c0_i32_11 : i32
    scf.if %13 {
      %c0_12 = arith.constant 0 : index
      %c0_13 = arith.constant 0 : index
      %14 = vector.load %arg9[%c0_12, %c0_13] : memref<8x32xf32, #tpu.memory_space<vmem>>, vector<8x32xf32>
      %c0_14 = arith.constant 0 : index
      %c0_15 = arith.constant 0 : index
      %c0_16 = arith.constant 0 : index
      %15 = vector.load %arg5[%c0_14, %c0_15, %c0_16] : memref<1x8x32xf32, #tpu.memory_space<vmem>>, vector<1x8x32xf32>
      %16 = vector.shape_cast %15 : vector<1x8x32xf32> to vector<8x32xf32>
      %17 = arith.addf %14, %16 : vector<8x32xf32>
      %cst_17 = arith.constant dense<0.000000e+00> : vector<8xf32>
      %18 = vector.multi_reduction <add>, %17, %cst_17 [1] : vector<8x32xf32> to vector<8xf32>
      %19 = vector.shape_cast %18 : vector<8xf32> to vector<8x1xf32>
      %cst_18 = arith.constant 3.200000e+01 : f32
      %20 = vector.broadcast %cst_18 : f32 to vector<8x1xf32>
      %21 = arith.divf %19, %20 : vector<8x1xf32>
      %22 = vector.broadcast %21 : vector<8x1xf32> to vector<8x32xf32>
      %23 = arith.subf %17, %22 : vector<8x32xf32>
      %24 = arith.mulf %23, %23 : vector<8x32xf32>
      %cst_19 = arith.constant dense<0.000000e+00> : vector<8xf32>
      %25 = vector.multi_reduction <add>, %24, %cst_19 [1] : vector<8x32xf32> to vector<8xf32>
      %26 = vector.shape_cast %25 : vector<8xf32> to vector<8x1xf32>
      %cst_20 = arith.constant 3.200000e+01 : f32
      %27 = vector.broadcast %cst_20 : f32 to vector<8x1xf32>
      %28 = arith.divf %26, %27 : vector<8x1xf32>
      %29 = vector.broadcast %21 : vector<8x1xf32> to vector<8x32xf32>
      %30 = arith.subf %17, %29 : vector<8x32xf32>
      %cst_21 = arith.constant 9.99999997E-7 : f32
      %31 = vector.broadcast %cst_21 : f32 to vector<8x1xf32>
      %32 = arith.addf %28, %31 : vector<8x1xf32>
      %33 = math.rsqrt %32 : vector<8x1xf32>
      %34 = vector.broadcast %33 : vector<8x1xf32> to vector<8x32xf32>
      %35 = arith.mulf %30, %34 : vector<8x32xf32>
      %c0_22 = arith.constant 0 : index
      %c0_23 = arith.constant 0 : index
      %36 = vector.load %arg6[%c0_22, %c0_23] : memref<1x32xf32, #tpu.memory_space<vmem>>, vector<1x32xf32>
      %37 = vector.broadcast %36 : vector<1x32xf32> to vector<8x32xf32>
      %38 = arith.mulf %35, %37 : vector<8x32xf32>
      %c0_24 = arith.constant 0 : index
      %c0_25 = arith.constant 0 : index
      %39 = vector.load %arg7[%c0_24, %c0_25] : memref<1x32xf32, #tpu.memory_space<vmem>>, vector<1x32xf32>
      %40 = vector.broadcast %39 : vector<1x32xf32> to vector<8x32xf32>
      %41 = arith.addf %38, %40 : vector<8x32xf32>
      %c0_26 = arith.constant 0 : index
      %c0_27 = arith.constant 0 : index
      %c0_28 = arith.constant 0 : index
      %42 = vector.load %arg8[%c0_26, %c0_27, %c0_28] : memref<1x8x32xf32, #tpu.memory_space<vmem>>, vector<1x8x32xf32>
      %43 = vector.shape_cast %42 : vector<1x8x32xf32> to vector<8x32xf32>
      %44 = vector.shape_cast %41 : vector<8x32xf32> to vector<1x8x32xf32>
      tpu.vector_store %arg8[%c0_26, %c0_27, %c0_28], %44 {strides = array<i32>} : memref<1x8x32xf32, #tpu.memory_space<vmem>>, vector<1x8x32xf32>,
    } else {
    }
    return
  }
  func.func @transform_0(%arg0: i32, %arg1: i32, %arg2: i32) -> (i32, i32, i32, i32) {
    %c0_i32 = arith.constant 0 : i32
    %c0_i32_0 = arith.constant 0 : i32
    return %arg0, %arg2, %arg1, %c0_i32 : i32, i32, i32, i32
  }
  func.func @transform_1(%arg0: i32, %arg1: i32, %arg2: i32) -> (i32, i32, i32) {
    %c0_i32 = arith.constant 0 : i32
    %c0_i32_0 = arith.constant 0 : i32
    %c0_i32_1 = arith.constant 0 : i32
    return %arg2, %c0_i32, %c0_i32_0 : i32, i32, i32
  }
  func.func @transform_2(%arg0: i32, %arg1: i32, %arg2: i32) -> (i32, i32, i32) {
    %c0_i32 = arith.constant 0 : i32
    %c0_i32_0 = arith.constant 0 : i32
    return %arg0, %arg1, %c0_i32 : i32, i32, i32
  }
  func.func @transform_3(%arg0: i32, %arg1: i32, %arg2: i32) -> (i32, i32) {
    %c0_i32 = arith.constant 0 : i32
    %c0_i32_0 = arith.constant 0 : i32
    %c0_i32_1 = arith.constant 0 : i32
    return %c0_i32, %c0_i32_0 : i32, i32
  }
  func.func @transform_4(%arg0: i32, %arg1: i32, %arg2: i32) -> (i32, i32) {
    %c0_i32 = arith.constant 0 : i32
    %c0_i32_0 = arith.constant 0 : i32
    %c0_i32_1 = arith.constant 0 : i32
    return %c0_i32, %c0_i32_0 : i32, i32
  }
  func.func @transform_5(%arg0: i32, %arg1: i32, %arg2: i32) -> (i32, i32, i32) {
    %c0_i32 = arith.constant 0 : i32
    %c0_i32_0 = arith.constant 0 : i32
    return %arg0, %arg1, %c0_i32 : i32, i32, i32
  }
}

</mosaic_0001>

<bundles_post_ra>
// kernel: multi_head_attention.3
= control target key start
LH: loop header
LB: loop body
LE: loop exit
PB: predicated region body
PF: predicated region fallthrough
CT: control target
= control target key end

     0   :  { %s1663_s0 = inlined_call_operand.hbm [shape: bf16[2,2,8,16], index: 0, kind: input, shape index: {}]   ;;  %s1664_s1 = inlined_call_operand.hbm [shape: bf16[2,16,32], index: 1, kind: input, shape index: {}]   ;;  %s1665_s2 = inlined_call_operand.hbm [shape: f32[2,8,32], index: 2, kind: input, shape index: {}]   ;;  %s1666_s3 = inlined_call_operand.hbm [shape: f32[1,32], index: 3, kind: input, shape index: {}]   ;;  %s1667_s4 = inlined_call_operand.hbm [shape: f32[1,32], index: 4, kind: input, shape index: {}]   ;;  %s1668_s5 = inlined_call_operand.hbm [shape: f32[2,8,32], index: 5, kind: output, shape index: {}]  }
   0x1   :  { %1686 = sst [smem:[#allocation26_spill]] %s1664_s1 }
   0x2   :  { %1687 = sst [smem:[#allocation27_spill]] %s1666_s3 }
   0x3   :  { %1688 = sst [smem:[#allocation28_spill]] %s1668_s5 }
   0x4   :  { %10 = vsyncpa [#allocation4], 0 }
   0x5   :  { %12 = vsyncpa [#allocation4 + $0x1], 0 }
   0x6   :  { %13 = vsyncpa [#allocation7], 0 }
   0x7   :  { %15 = vsyncpa [#allocation7 + $0x1], 0 }
   0x8   :  { %16 = vsyncpa [#allocation10], 0 }
   0x9   :  { %17 = vsyncpa [#allocation5], 0 }
   0xa   :  { %19 = vsyncpa [#allocation5 + $0x1], 0  ;;  %s1190_s18 = smov 0   ;;  %s1192_s19 = smov 0  }
   0xb   :  { %s1194_s20 = smov 0   ;;  %s1196_s21 = smov 0  }
   0xc   :  { %s1198_s22 = smov 0   ;;  %s1200_s23 = smov 0  }
   0xd   :  { %s1202_s24 = smov 0   ;;  %s1204_s25 = smov 0  }
   0xe   :  { %s1206_s26 = smov 0   ;;  %s1208_s27 = smov 0  }
   0xf   :  { %s1210_s28 = smov 0   ;;  %s1212_s29 = smov 0  }
  0x10   :  { %s1214_s30 = smov 0   ;;  %s1216_s6 = smov 0  }
  0x11 LB: > { %1689 = sst [smem:[#allocation18_spill]] %s1111_s22  ;;  %s1261_s7 = sadd.s32 4294967295, %s1147_s6   ;;  %s1147_s6 = sphi %s1216_s6, %s25_s6   ;;  %s1143_s30 = sphi %s1214_s30, %s1755_s30   ;;  %s1139_s29 = sphi %s1212_s29, %s1754_s29   ;;  %s1135_s28 = sphi %s1210_s28, %s1753_s28   ;;  %s1131_s27 = sphi %s1208_s27, %s1752_s27   ;;  %s1127_s26 = sphi %s1206_s26, %s1751_s26   ;;  %s1123_s25 = sphi %s1204_s25, %s1750_s25   ;;  %s1119_s24 = sphi %s1202_s24, %s1749_s24   ;;  %s1115_s23 = sphi %s1200_s23, %s1742_s23   ;;  %s1111_s22 = sphi %s1198_s22, %s1741_s22   ;;  %s1107_s21 = sphi %s1196_s21, %s1748_s21   ;;  %s1103_s20 = sphi %s1194_s20, %s1747_s20   ;;  %s1099_s19 = sphi %s1192_s19, %s1746_s19   ;;  %s1095_s18 = sphi %s1190_s18, %s1745_s18  }
  0x12   : > { %1690 = sst [smem:[#allocation19_spill]] %s1115_s23  ;;  %p640_p0 = scmp.ge.s32.totalorder %s1147_s6, 1 }
  0x13   : > { %1691 = sst [smem:[#allocation20_spill]] %s1131_s27  ;;  %p1669_p1 = scmp.eq.s32.totalorder %s1261_s7, 0 }
  0x14   : > { %1692 = sst [smem:[#allocation21_spill]] %s1135_s28  ;;  %p203_p3 = scmp.lt.s32.totalorder %s1147_s6, 5 }
  0x15   : > { %s1149_s9 = smov [#allocation9]   ;;  %s1696_s3 = sld [smem:[#allocation27_spill]] }
  0x16   : > { %p1267_p4 = pnand %p640_p0, %p203_p3  ;;  %s216_s10 = sshll.u32 %s1149_s9, 4  ;;  %s217_s10 = int_to_ptr.vmem [resolvable:$true] %s216_s10 }
  0x18   : > { %s1693_s8 = scalar_select %p1267_p4, 1, 0 }
  0x19   : > { %p694_p5 = pneg %p1267_p4 }
  0x1a   : > { %1694 = sst [smem:[#allocation22_spill]] %s1693_s8 }
  0x1b   : > { %p1275_p6 = pnand %p694_p5, %p1669_p1  ;;  %s843_s14 = scalar_lea.hbm %s1696_s3, 16 }
  0x1c   : > { %p844_p7 = scmp.ne.s32.totalorder %s1696_s3, %s843_s14  ;;  %p850_p11 = scmp.lt.u32.totalorder %s843_s14, %s1696_s3 }
  0x1d   : > { %p1679_p8 = pneg %p1275_p6 }
  0x1f   : > { %p846_p9 = pnand %p1679_p8, %p844_p7 }
  0x21   : > { %p847_p10 = pneg %p846_p9 }
  0x23   : > { %p852_p12 = pnand %p850_p11, %p847_p10 }
  0x25   : > { %855 = shalt.err (!%p852_p12)
}
  0x26   : > { %s856_s12 = scalar_lea.vmem %s217_s10, 16  ;;  %s863_s13 = scalar_lea.vmem %s217_s10, 32 }
  0x27   : > { %p857_p13 = scmp.ne.s32.totalorder %s217_s10, %s856_s12  ;;  %p864_p5 = scmp.lt.s32.totalorder %s217_s10, %s217_s10 }
  0x28   : > { %p865_p2 = scmp.lt.s32.totalorder %s863_s13, %s856_s12 }
  0x29   : > { %p859_p0 = pnand %p857_p13, %p1679_p8 }
  0x2a   : > { %p866_p1 = por %p865_p2, %p864_p5 }
  0x2b   : > { %p860_p3 = pneg %p859_p0 }
  0x2d   : > { %p867_p4 = pnand %p866_p1, %p860_p3 }
  0x2f   : > { %870 = shalt.err (!%p867_p4)
}
  0x30   : > { %697 = dma.hbm_to_vmem [thread:$0]  (!%p1275_p6), %s1696_s3, 16, %s217_s10, [#allocation10]  }
  0x31   : > { %s37_s14 = sadd.s32 1, %s1139_s29  ;;  %p1678_p1 = scmp.eq.s32.totalorder %s1147_s6, 0 }
  0x32   : > { %p1303_p2 = scmp.ge.s32.totalorder %s37_s14, 2  ;;  %s81_s9 = sadd.s32 1, %s1115_s23 }
  0x33   : > { %p88_p4 = scmp.ne.s32.totalorder %s1115_s23, %s1111_s22  ;;  %p94_p7 = scmp.ne.s32.totalorder %s1111_s22, %s1107_s21 }
  0x34   : > { %s1697_s17 = scalar_select %p1303_p2, 1, 0 }
  0x35   : > { %s1757_s14 = smov (%p1303_p2, %s37_s14), 0  ;;  %p1318_p9 = por %p88_p4, %p1678_p1 }
  0x36   : > { %1698 = sst [smem:[#allocation23_spill]] %s1757_s14  ;;  %p1700_p10 = scmp.eq.s32.totalorder %s1261_s7, 0 }
  0x37   : > { %s1330_s13 = ssub.s32 %s1139_s29, %s1757_s14  ;;  %p1677_p12 = scmp.lt.s32.totalorder %s1147_s6, 4 }
  0x38   : > { %p1324_p11 = por %p94_p7, %p1700_p10  ;;  %p79_p13 = scmp.eq.s32.totalorder %s1330_s13, 0 }
  0x39   : > { %s259_s21 = sand.u32 1, %s1147_s6   ;;  %s261_s15 = sand.u32 1, %s1115_s23  }
  0x3a   : > { %s1701_s10 = scalar_select %p1324_p11, 1, 0 }
  0x3b   : > { %s1337_s16 = scalar_select %p79_p13, %s1115_s23, %s81_s9  }
  0x3c   : > { %1702 = sst [smem:[#allocation24_spill]] %s1701_s10  ;;  %s647_s3 = sshll.u32 %s261_s15, 3 }
  0x3d   : > { %1703 = sst [smem:[#allocation25_spill]] %s1337_s16  ;;  %s669_s5 = sshll.u32 %s1139_s29, 7 }
  0x3e   : > { %s1704_s1 = sld [smem:[#allocation26_spill]]  ;;  %s263_s14 = scalar_lea.vmem [#allocation6], %s647_s3 }
  0x3f   : > { %s270_s10 = sshll.u32 %s263_s14, 4  ;;  %p1349_p0 = pnand %p1677_p12, %p1318_p9  ;;  %s1353_s10 = int_to_ptr.vmem [resolvable:$true] %s270_s10 }
  0x40   : > { %s1355_s9 = scalar_lea.sflag [#allocation7], %s259_s21 }
  0x41   : > { %p873_p5 = pneg %p1349_p0 }
  0x44   : > { %s1343_s22 = scalar_lea.hbm %s1704_s1, %s669_s5  ;;  %s876_s28 = scalar_lea.hbm %s1704_s1, 256 }
  0x45   : > { %s871_s5 = scalar_lea.hbm %s1343_s22, 128  ;;  %p877_p9 = scmp.lt.u32.totalorder %s1343_s22, %s1704_s1 }
  0x46   : > { %p872_p3 = scmp.ne.s32.totalorder %s1343_s22, %s871_s5  ;;  %p878_p10 = scmp.lt.u32.totalorder %s876_s28, %s871_s5 }
  0x47   : > { %p880_p12 = scmp.lt.u32.totalorder %s871_s5, %s1343_s22 }
  0x48   : > { %p874_p4 = pnand %p873_p5, %p872_p3  ;;  %p879_p13 = por %p878_p10, %p877_p9 }
  0x4a   : > { %p875_p7 = pneg %p874_p4  ;;  %p881_p1 = por %p880_p12, %p879_p13 }
  0x4c   : > { %p882_p8 = pnand %p881_p1, %p875_p7 }
  0x4e   : > { %885 = shalt.err (!%p882_p8)
}
  0x4f   : > { %s886_s21 = scalar_lea.vmem %s1353_s10, 128  ;;  %s1150_s15 = smov [#allocation6]  }
  0x50   : > { %p887_p3 = scmp.ne.s32.totalorder %s1353_s10, %s886_s21  ;;  %s891_s3 = sshll.u32 %s1150_s15, 4  ;;  %s892_s3 = int_to_ptr.vmem [resolvable:$false] %s891_s3 }
  0x51   : > { %s893_s27 = scalar_lea.vmem %s892_s3, 256  ;;  %p894_p2 = scmp.lt.s32.totalorder %s1353_s10, %s892_s3 }
  0x52   : > { %p889_p4 = pnand %p887_p3, %p873_p5  ;;  %p895_p9 = scmp.lt.s32.totalorder %s893_s27, %s886_s21 }
  0x54   : > { %p890_p11 = pneg %p889_p4  ;;  %p896_p10 = por %p895_p9, %p894_p2 }
  0x56   : > { %p897_p12 = pnand %p896_p10, %p890_p11 }
  0x58   : > { %900 = shalt.err (!%p897_p12)
}
  0x59   : > { %s1151_s5 = smov 64   ;;  %s1152_s28 = smov 4  }
  0x5a   : > { %707 = dma.hbm_to_vmem [thread:$0]  (!%p1349_p0), %s1343_s22, 128, %s1353_s10, %s1355_s9, %s1151_s5, %s1151_s5, %s1152_s28  }
  0x5b   : > { %s1153_s14 = smov [#allocation11]   ;;  %s901_s3 = scalar_lea.hbm %s1667_s4, 16 }
  0x5c   : > { %s227_s12 = sshll.u32 %s1153_s14, 4  ;;  %p902_p8 = scmp.ne.s32.totalorder %s1667_s4, %s901_s3  ;;  %s228_s12 = int_to_ptr.vmem [resolvable:$true] %s227_s12 }
  0x5d   : > { %p1706_p1 = pneg %p1275_p6  ;;  %p908_p5 = scmp.lt.u32.totalorder %s901_s3, %s1667_s4 }
  0x5f   : > { %p904_p2 = pnand %p902_p8, %p1706_p1 }
  0x61   : > { %p905_p11 = pneg %p904_p2 }
  0x63   : > { %p910_p0 = pnand %p908_p5, %p905_p11 }
  0x65   : > { %913 = shalt.err (!%p910_p0)
}
  0x66   : > { %s914_s22 = scalar_lea.vmem %s228_s12, 16  ;;  %p1707_p13 = pmov %p1706_p1 }
  0x67   : > { %p915_p7 = scmp.ne.s32.totalorder %s228_s12, %s914_s22  ;;  %s921_s1 = scalar_lea.vmem %s228_s12, 32 }
  0x68   : > { %p922_p9 = scmp.lt.s32.totalorder %s228_s12, %s228_s12  ;;  %p923_p10 = scmp.lt.s32.totalorder %s921_s1, %s914_s22 }
  0x69   : > { %p917_p3 = pnand %p915_p7, %p1707_p13 }
  0x6a   : > { %p924_p12 = por %p923_p10, %p922_p9 }
  0x6b   : > { %p918_p4 = pneg %p917_p3 }
  0x6d   : > { %p925_p1 = pnand %p924_p12, %p918_p4 }
  0x6f   : > { %928 = shalt.err (!%p925_p1)
}
  0x70   : > { %700 = dma.hbm_to_vmem [thread:$0]  (!%p1275_p6), %s1667_s4, 16, %s228_s12, [#allocation10]  }
  0x71   : > { %s44_s10 = sadd.s32 1, %s1143_s30  ;;  %p1708_p8 = scmp.ne.s32.totalorder %s1697_s17, 0 }
  0x72   : > { %s55_s11 = sadd.s32 1, %s1127_s26  ;;  %p62_p2 = scmp.ne.s32.totalorder %s1127_s26, %s1123_s25 }
  0x73   : > { %s1759_s10 = smov (!%p1708_p8, %s44_s10), %s1143_s30  ;;  %p68_p5 = scmp.ne.s32.totalorder %s1123_s25, %s1119_s24 }
  0x74   : > { %p46_p11 = scmp.ge.s32.totalorder %s1759_s10, 2  ;;  %p1709_p0 = scmp.eq.s32.totalorder %s1147_s6, 0 }
  0x75   : > { %s238_s5 = sand.u32 1, %s1127_s26   ;;  %p1711_p6 = scmp.eq.s32.totalorder %s1261_s7, 0 }
  0x76   : > { %p1414_p7 = por %p1709_p0, %p62_p2  ;;  %s1761_s10 = smov (%p46_p11, %s1759_s10), 0 }
  0x77   : > { %p1423_p13 = por %p1711_p6, %p68_p5  ;;  %s1429_s28 = ssub.s32 %s1143_s30, %s1761_s10 }
  0x78   : > { %s644_s24 = sshll.u32 %s238_s5, 2  ;;  %s50_s14 = sor.u32 %s1330_s13, %s1429_s28 }
  0x79   : > { %s1712_s17 = scalar_select %p1423_p13, 1, 0 }
  0x7a   : > { %p53_p4 = scmp.eq.s32.totalorder %s50_s14, 0  ;;  %s645_s12 = sshll.u32 %s1143_s30, 1 }
  0x7b   : > { %s242_s15 = scalar_lea.vmem [#allocation3], %s644_s24  ;;  %s248_s27 = sadd.s32 %s1139_s29, %s645_s12 }
  0x7c   : > { %s252_s3 = sshll.u32 %s242_s15, 4  ;;  %s646_s22 = sshll.u32 %s248_s27, 6  ;;  %s1439_s3 = int_to_ptr.vmem [resolvable:$true] %s252_s3 }
  0x7d   : > { %s1436_s21 = scalar_select %p53_p4, %s1127_s26, %s55_s11  }
  0x7e   : > { %p1713_p9 = scmp.lt.s32.totalorder %s1147_s6, 4  ;;  %s1452_s13 = scalar_lea.hbm %s1663_s0, %s646_s22 }
  0x7f   : > { %s239_s11 = scalar_lea.sflag [#allocation4], %s238_s5  ;;  %s929_s24 = scalar_lea.hbm %s1452_s13, 64 }
  0x80   : > { %p1445_p10 = pnand %p1713_p9, %p1414_p7  ;;  %p930_p12 = scmp.ne.s32.totalorder %s1452_s13, %s929_s24 }
  0x81   : > { %s934_s12 = scalar_lea.hbm %s1663_s0, 256  ;;  %p935_p11 = scmp.lt.u32.totalorder %s1452_s13, %s1663_s0 }
  0x82   : > { %p931_p1 = pneg %p1445_p10  ;;  %p936_p5 = scmp.lt.u32.totalorder %s934_s12, %s929_s24 }
  0x83   : > { %p938_p7 = scmp.lt.u32.totalorder %s929_s24, %s1452_s13 }
  0x84   : > { %p932_p8 = pnand %p931_p1, %p930_p12  ;;  %p937_p0 = por %p936_p5, %p935_p11 }
  0x86   : > { %p933_p2 = pneg %p932_p8  ;;  %p939_p6 = por %p938_p7, %p937_p0 }
  0x88   : > { %p940_p4 = pnand %p939_p6, %p933_p2 }
  0x8a   : > { %943 = shalt.err (!%p940_p4)
}
  0x8b   : > { %s944_s5 = scalar_lea.vmem %s1439_s3, 64  ;;  %s1154_s22 = smov [#allocation3]  }
  0x8c   : > { %p945_p9 = scmp.ne.s32.totalorder %s1439_s3, %s944_s5  ;;  %s949_s8 = sshll.u32 %s1154_s22, 4  ;;  %s950_s8 = int_to_ptr.vmem [resolvable:$false] %s949_s8 }
  0x8d   : > { %s951_s23 = scalar_lea.vmem %s950_s8, 128  ;;  %p952_p3 = scmp.lt.s32.totalorder %s1439_s3, %s950_s8 }
  0x8e   : > { %p947_p12 = pnand %p945_p9, %p931_p1  ;;  %p953_p11 = scmp.lt.s32.totalorder %s951_s23, %s944_s5 }
  0x90   : > { %p948_p8 = pneg %p947_p12  ;;  %p954_p5 = por %p953_p11, %p952_p3 }
  0x92   : > { %p955_p0 = pnand %p954_p5, %p948_p8 }
  0x94   : > { %958 = shalt.err (!%p955_p0)
}
  0x95   : > { %704 = dma.hbm_to_vmem [thread:$0]  (!%p1445_p10), %s1452_s13, 64, %s1439_s3, %s239_s11  }
  0x96   : > { %s639_s24 = sadd.s32 4294967294, %s1147_s6   ;;  %s109_s16 = sadd.s32 1, %s1103_s20 }
  0x97   : > { %p1715_p3 = scmp.eq.s32.totalorder %s1429_s28, 0  ;;  %p116_p1 = scmp.ne.s32.totalorder %s1103_s20, %s1099_s19 }
  0x98   : > { %p122_p2 = scmp.ne.s32.totalorder %s1099_s19, %s1095_s18  ;;  %p196_p7 = scmp.eq.s32.totalorder %s639_s24, 3 }
  0x99   : > { %s1484_s1 = scalar_select %p1715_p3, %s1103_s20, %s109_s16  }
  0x9a   : > { %s282_s14 = sand.u32 1, %s1103_s20   ;;  %p1716_p6 = scmp.eq.s32.totalorder %s1147_s6, 0 }
  0x9b   : > { %p1717_p9 = scmp.eq.s32.totalorder %s1261_s7, 0  ;;  %p1719_p8 = scmp.eq.s32.totalorder %s1261_s7, 3 }
  0x9c   : > { %p118_p4 = por %p116_p1, %p1716_p6  ;;  %p1505_p10 = por %p196_p7, %p122_p2 }
  0x9d   : > { %p1495_p12 = por %p122_p2, %p1717_p9  ;;  %p1501_p11 = por %p1719_p8, %p116_p1 }
  0x9e   : > { %s1721_s28 = scalar_select %p1505_p10, 1, 0 }
  0x9f   : > { %s1718_s12 = scalar_select %p1495_p12, 1, 0 }
  0xa0   : > { %s1720_s3 = scalar_select %p1501_p11, 1, 0 }
  0xa1   : > { %s650_s13 = sshll.u32 %s282_s14, 3  ;;  %s651_s11 = sshll.u32 %s1143_s30, 7 }
  0xa2   : > { %s1513_s5 = scalar_lea.hbm %s1665_s2, %s651_s11  ;;  %s284_s22 = scalar_lea.vmem [#allocation8], %s650_s13 }
  0xa3   : > { %s292_s8 = sshll.u32 %s284_s22, 4  ;;  %p1722_p5 = scmp.lt.s32.totalorder %s1147_s6, 4  ;;  %s293_s8 = int_to_ptr.vmem [resolvable:$true] %s292_s8 }
  0xa4   : > { %s959_s24 = scalar_lea.hbm %s1513_s5, 128  ;;  %s964_s13 = scalar_lea.hbm %s1665_s2, 256 }
  0xa5   : > { %p1517_p0 = pnand %p1722_p5, %p118_p4  ;;  %p960_p3 = scmp.ne.s32.totalorder %s1513_s5, %s959_s24 }
  0xa6   : > { %p965_p6 = scmp.lt.u32.totalorder %s1513_s5, %s1665_s2  ;;  %p966_p4 = scmp.lt.u32.totalorder %s964_s13, %s959_s24 }
  0xa7   : > { %p961_p1 = pneg %p1517_p0  ;;  %p968_p8 = scmp.lt.u32.totalorder %s959_s24, %s1513_s5 }
  0xa8   : > { %p967_p9 = por %p966_p4, %p965_p6 }
  0xa9   : > { %p962_p2 = pnand %p961_p1, %p960_p3 }
  0xaa   : > { %p969_p5 = por %p968_p8, %p967_p9 }
  0xab   : > { %p963_p7 = pneg %p962_p2 }
  0xad   : > { %p970_p10 = pnand %p969_p5, %p963_p7 }
  0xaf   : > { %973 = shalt.err (!%p970_p10)
}
  0xb0   : > { %s974_s27 = scalar_lea.vmem %s293_s8, 128  ;;  %s1155_s22 = smov [#allocation8]  }
  0xb1   : > { %p975_p11 = scmp.ne.s32.totalorder %s293_s8, %s974_s27  ;;  %s979_s16 = sshll.u32 %s1155_s22, 4  ;;  %s980_s16 = int_to_ptr.vmem [resolvable:$false] %s979_s16 }
  0xb2   : > { %s981_s14 = scalar_lea.vmem %s980_s16, 256  ;;  %p982_p12 = scmp.lt.s32.totalorder %s293_s8, %s980_s16 }
  0xb3   : > { %p977_p3 = pnand %p975_p11, %p961_p1  ;;  %p983_p13 = scmp.lt.s32.totalorder %s981_s14, %s974_s27 }
  0xb5   : > { %p978_p2 = pneg %p977_p3  ;;  %p984_p4 = por %p983_p13, %p982_p12 }
  0xb7   : > { %p985_p6 = pnand %p984_p4, %p978_p2 }
  0xb9   : > { %988 = shalt.err (!%p985_p6)
}
  0xba   : > { %710 = dma.hbm_to_vmem [thread:$0]  (!%p1517_p0), %s1513_s5, 128, %s293_s8, %s1355_s9  }
  0xbb   : > { %s1724_s24 = sld [smem:[#allocation22_spill]] }
  0xc1   : > { %p1725_p10 = scmp.ne.s32.totalorder %s1724_s24, 0 }
  0xc2   : > { %s303_s13 = sand.u32 (!%p1725_p10), 1, %s1123_s25   ;;  %p1726_p11 = scmp.ne.s32.totalorder (!%p1725_p10), %s1712_s17, 0 }
  0xc3   : > { %301 = sbr.rel (%p1725_p10) target bundleno = 805 (0x325), region = 40  ;;  %s1546_s11 = sshll.u32 (!%p1725_p10), %s303_s13, 2 }
  0xc4   : > { %s304_s15 = scalar_lea.sflag (!%p1725_p10), [#allocation4], %s303_s13  ;;  %s307_s22 = scalar_lea.vmem (!%p1725_p10), [#allocation3], %s1546_s11 }
  0xca   : > { %1074 = dma.done.wait (%p1726_p11), %s304_s15, 64  }
  0xcb   : > { %1076 = vsyncadd (%p1726_p11), %s304_s15, 4294967232  ;;  %s1727_s23 = sld [smem:[#allocation18_spill]]  ;;  %s1728_s27 = sld [smem:[#allocation24_spill]] }
  0xcc   : > { %s312_s9 = sand.u32 1, %s1261_s7  }
  0xcd   : > { %s313_s16 = scalar_lea.sflag [#allocation7], %s312_s9 }
  0xd1   : > { %s314_s5 = sand.u32 1, %s1727_s23   ;;  %p1729_p13 = scmp.ne.s32.totalorder %s1728_s27, 0 }
  0xd2   : > { %s654_s8 = sshll.u32 %s314_s5, 3 }
  0xd3   : > { %s316_s14 = scalar_lea.vmem [#allocation6], %s654_s8 }
  0xd4   : > { %1078 = dma.done.wait (%p1729_p13), %s313_s16, 128  }
  0xd5   : > { %1080 = vsyncadd (%p1729_p13), %s313_s16, 4294967168  ;;  %s323_s24 = sand.u32 1, %s1099_s19   ;;  %p1730_p12 = scmp.ne.s32.totalorder %s1718_s12, 0 }
  0xd6   : > { %s1562_s17 = sshll.u32 %s323_s24, 3 }
  0xd7   : > { %s325_s13 = scalar_lea.vmem [#allocation8], %s1562_s17 }
  0xd8   : > { %1082 = dma.done.wait (%p1730_p12), %s313_s16, 128  }
  0xd9   : > { %1084 = vsyncadd (%p1730_p12), %s313_s16, 4294967168  ;;  %p1731_p0 = scmp.eq.s32.totalorder %s1261_s7, 0 }
  0xdb   : > { %1086 = dma.done.wait (%p1731_p0), [#allocation10], 32   ;;  %p1732_p1 = pmov %p1731_p0 }
  0xdc   : > { %s369_s11 = scalar_lea.vmem [#allocation12], %s1562_s17  ;;  %s1733_s15 = sld [smem:[#allocation20_spill]] }
  0xdd   : > { %1088 = vsyncadd (%p1732_p1), [#allocation10], 4294967264 }
  0xe2   : > { %p659_p7 = scmp.ne.s32.totalorder %s1733_s15, 0 }
  0xe3   : > { %vm375_vm0 = vcmask (!%p659_p7), 261120   ;;  %v1156_v0 = vmov (!%p659_p7), 0.0  }
  0xe4   : > { %374 = sbr.rel (%p659_p7) target bundleno = 235 (0xeb), region = 64  ;;  %376 = vst.msk [vmem:[#allocation2] sm:$0xff] (!%p659_p7), %vm375_vm0, %v1156_v0 }
  0xeb PF: > { %v840_v1 = vld [vmem:[%s316_s14] sm:$0xff]   ;;  %v1157_v2 = vmov 0.0   ;;  %vm1158_vm1 = vmmov 0   ;;  %v378_v3 = vld [vmem:[%s307_s22] sm:$0xf]  ;;  %vm387_vm2 = vcmask 130048  }
  0xec   : > { %672 = vmatprep.subr.bf16.mxu0 %v1157_v2  ;;  %674 = vmatprep.mubr.msk.bf16.mxu0 %vm1158_vm1, %v1157_v2  ;;  %v377_v4 = vld [vmem:[#allocation2] sm:$0xff]  ;;  %vm432_vm3 = vcmask 261120   ;;  %s1734_s7 = sld [smem:[#allocation20_spill]] }
  0xed   : > { %673 = vmatpush3.bf16.msra.mxu0 %v840_v1 }
  0xf0   : > { %675 = vmatmul.mubr.msk.bf16.vlgmr.msra.gmra.mrb[0].mxu0 %vm387_vm2, %v378_v3 }
  0xf2   : > { %p662_p9 = scmp.ne.s32.totalorder %s1734_s7, 1 }
  0xf3   : > { %v439_v11 = vld [vmem:[%s325_s13] sm:$0xff] (!%p662_p9)  ;;  %v663_v23 = vld [vmem:[#allocation9] ss:$0 sm:$0xff] (!%p662_p9)  ;;  %v664_v25 = vld [vmem:[#allocation11] ss:$0 sm:$0xff] (!%p662_p9) }
 0x1c0   : > { %437 = sbr.rel (%p662_p9) target bundleno = 778 (0x30a), region = 68 }
 0x1c3   : > { %v425_v5 = vpop.f32.mrb[0].mxu0 }
 0x1c4   : > { %v431_v6 = vadd.f32 %v425_v5, %v377_v4  ;;  %v676_v7 = vpop.f32.mrb[1].mxu0 }
 0x1c5   : > { %v428_v8 = vpop.f32.mrb[2].mxu0 }
 0x1c6   : > { %433 = vst.msk [vmem:[#allocation2] sm:$0xff] %vm432_vm3, %v431_v6  ;;  %v677_v9 = vpop.f32.mrb[3].mxu0 }
 0x1cd   : > { %v438_v10 = vld [vmem:[#allocation2] sm:$0xff] }
 0x1ce   : > { %v440_v12 = vadd.f32 %v439_v11, %v438_v10 }
 0x1d0   : > { %v441_v13 = vsel %vm432_vm3, %v440_v12, 0.0 }
 0x1d1   : > { %442 = vadd.xlane.f32.xlu0 %v441_v13 }
 0x25e   : > { %v443_v14 = vpop.xlane.xlu0 %442 }
 0x25f   : > { %v445_v15 = vmul.f32 0.03125, %v443_v14 }
 0x261   : > { %v446_v16 = vsub.f32 %v440_v12, %v445_v15 }
 0x263   : > { %v447_v17 = vmul.f32 %v446_v16, %v446_v16 }
 0x265   : > { %v448_v18 = vsel %vm432_vm3, %v447_v17, 0.0 }
 0x266   : > { %449 = vadd.xlane.f32.xlu0 %v448_v18 }
 0x2f3   : > { %v450_v19 = vpop.xlane.xlu0 %449 }
 0x2f4   : > { %v451_v20 = vmul.f32 0.03125, %v450_v19 }
 0x2f6   : > { %v452_v21 = vadd.f32 1e-06, %v451_v20 }
 0x2f8   : > { %841 = vrsqrt.f32 %v452_v21 }
 0x302   : > { %v842_v22 = vpop.eup %841 }
 0x303   : > { %v454_v24 = vmul.f32 %v842_v22, %v446_v16 }
 0x305   : > { %v462_v26 = vmul.f32 %v663_v23, %v454_v24 }
 0x307   : > { %v470_v27 = vadd.f32 %v664_v25, %v462_v26 }
 0x309   : > { %471 = vst.msk [vmem:[%s369_s11] sm:$0xff] %vm432_vm3, %v470_v27 }
 0x30a PF: > { %s1735_s12 = sld [smem:[#allocation21_spill]]  ;;  %s1736_s9 = sld [smem:[#allocation28_spill]] }
 0x30b   : > { %s487_s8 = sshll.u32 %s369_s11, 4  ;;  %s473_s16 = scalar_lea.sflag [#allocation5], %s323_s24  ;;  %s488_s8 = int_to_ptr.vmem [resolvable:$true] %s487_s8 }
 0x30c   : > { %s989_s14 = scalar_lea.vmem %s488_s8, 128  ;;  %p1737_p5 = scmp.ne.s32.totalorder %s1720_s3, 0 }
 0x30d   : > { %p990_p8 = scmp.ne.s32.totalorder %s488_s8, %s989_s14  ;;  %s1159_s13 = smov [#allocation12]  }
 0x30e   : > { %s993_s15 = sshll.u32 %s1159_s13, 4  ;;  %s994_s15 = int_to_ptr.vmem [resolvable:$false] %s993_s15 }
 0x30f   : > { %p991_p3 = pnand %p990_p8, %p1737_p5  ;;  %s995_s7 = scalar_lea.vmem %s994_s15, 256 }
 0x310   : > { %s666_s22 = sshll.u32 %s1735_s12, 7  ;;  %p996_p4 = scmp.lt.s32.totalorder %s488_s8, %s994_s15 }
 0x311   : > { %s1588_s5 = scalar_lea.hbm %s1736_s9, %s666_s22  ;;  %p992_p2 = pneg %p991_p3 }
 0x312   : > { %p997_p6 = scmp.lt.s32.totalorder %s995_s7, %s989_s14 }
 0x314   : > { %p998_p10 = por %p997_p6, %p996_p4 }
 0x316   : > { %p999_p11 = pnand %p998_p10, %p992_p2 }
 0x318   : > { %1002 = shalt.err (!%p999_p11)
}
 0x319   : > { %s1003_s24 = scalar_lea.hbm %s1588_s5, 128  ;;  %s1007_s12 = scalar_lea.hbm %s1736_s9, 256 }
 0x31a   : > { %p1004_p13 = scmp.ne.s32.totalorder %s1588_s5, %s1003_s24  ;;  %p1008_p1 = scmp.lt.u32.totalorder %s1588_s5, %s1736_s9 }
 0x31b   : > { %p1009_p7 = scmp.lt.u32.totalorder %s1007_s12, %s1003_s24  ;;  %p1011_p8 = scmp.lt.u32.totalorder %s1003_s24, %s1588_s5 }
 0x31c   : > { %p1005_p12 = pnand %p1004_p13, %p1737_p5 }
 0x31d   : > { %p1010_p9 = por %p1009_p7, %p1008_p1 }
 0x31e   : > { %p1006_p0 = pneg %p1005_p12 }
 0x31f   : > { %p1012_p3 = por %p1011_p8, %p1010_p9 }
 0x321   : > { %p1013_p2 = pnand %p1012_p3, %p1006_p0 }
 0x323   : > { %1016 = shalt.err (!%p1013_p2)
}
 0x324   : > { %692 = dma.vmem_to_hbm [thread:$0]  (%p1737_p5), %s488_s8, 128, %s1588_s5, %s473_s16  }
 0x325 PF: > { %p720_p4 = scmp.ge.s32.totalorder %s1147_s6, 2  ;;  %s499_s27 = sand.u32 1, %s1095_s18  }
 0x326   : > { %p1738_p6 = scmp.ne.s32.totalorder %s1721_s28, 0  ;;  %s500_s14 = scalar_lea.sflag [#allocation5], %s499_s27 }
 0x328   : > { %p712_p10 = pnand %p720_p4, %p1738_p6 }
 0x32a   : > { %1090 = dma.done.wait (!%p712_p10), %s500_s14, 128  }
 0x32b   : > { %1092 = vsyncadd (!%p712_p10), %s500_s14, 4294967168  ;;  %s25_s6 = sadd.s32 1, %s1147_s6   ;;  %s1740_s3 = sld [smem:[#allocation18_spill]] }
 0x32c   : > { %p1616_p11 = scmp.ge.s32.totalorder %s25_s6, 6   ;;  %s1741_s22 = sld [smem:[#allocation19_spill]] }
 0x32d   : > { %s1742_s23 = sld [smem:[#allocation25_spill]]  ;;  %s1743_s5 = smov %s1436_s21 }
 0x32e   : > { %s1744_s8 = sld [smem:[#allocation23_spill]]  ;;  %s1745_s18 = smov %s1099_s19 }
 0x32f   : > { %s1746_s19 = smov %s1103_s20  ;;  %s1747_s20 = smov %s1484_s1 }
 0x330   : > { %s1749_s24 = smov %s1123_s25  ;;  %s1750_s25 = smov %s1127_s26 }
 0x331   : > { %s1748_s21 = smov %s1740_s3  ;;  %s1751_s26 = smov %s1743_s5 }
 0x332   : > { %s1752_s27 = smov %s1139_s29  ;;  %s1753_s28 = smov %s1143_s30 }
 0x333   : > { %s1755_s30 = smov %s1761_s10  ;;  %24 = sbr.rel (!%p1616_p11) target bundleno = 17 (0x11), region = 125 }
 0x334   : > { %s1754_s29 = smov %s1744_s8 }
 0x33a   :  { %505 = vsyncpa [#allocation4], 1 }
 0x33b   :  { %507 = vsyncpa [#allocation4 + $0x1], 1 }
 0x33c   :  { %508 = vsyncpa [#allocation7], 1 }
 0x33d   :  { %510 = vsyncpa [#allocation7 + $0x1], 1 }
 0x33e   :  { %511 = vsyncpa [#allocation10], 1 }
 0x33f   :  { %512 = vsyncpa [#allocation5], 1 }
 0x340   :  { %514 = vsyncpa [#allocation5 + $0x1], 1 }

// kernel: multi_head_attention.2
= control target key start
LH: loop header
LB: loop body
LE: loop exit
PB: predicated region body
PF: predicated region fallthrough
CT: control target
= control target key end

     0   :  { %s2490_s0 = inlined_call_operand.hbm [shape: f32[2,8,32], index: 0, kind: input, shape index: {}]   ;;  %s2491_s1 = inlined_call_operand.hbm [shape: bf16[2,8,32], index: 1, kind: input, shape index: {}]   ;;  %s2492_s2 = inlined_call_operand.hbm [shape: bf16[2,8,32], index: 2, kind: input, shape index: {}]   ;;  %s2493_s3 = inlined_call_operand.hbm [shape: bf16[2,32,16], index: 3, kind: input, shape index: {}]   ;;  %s2494_s4 = inlined_call_operand.hbm [shape: bf16[2,32,16], index: 4, kind: input, shape index: {}]   ;;  %s2495_s5 = inlined_call_operand.hbm [shape: bf16[2,32,16], index: 5, kind: input, shape index: {}]   ;;  %s2496_s6 = inlined_call_operand.hbm [shape: f32[2,1,8], index: 6, kind: input, shape index: {}]   ;;  %s2497_s7 = inlined_call_operand.hbm [shape: bf16[2,2,8,16], index: 7, kind: output, shape index: {0}]   ;;  %s2498_s8 = inlined_call_operand.hbm [shape: bf16[2,2,8,8], index: 8, kind: output, shape index: {1}]  }
   0x1   :  { %2534 = sst [smem:[#allocation41_spill]] %s2491_s1 }
   0x2   :  { %2535 = sst [smem:[#allocation42_spill]] %s2493_s3 }
   0x3   :  { %2536 = sst [smem:[#allocation43_spill]] %s2494_s4 }
   0x4   :  { %2537 = sst [smem:[#allocation44_spill]] %s2495_s5 }
   0x5   :  { %2538 = sst [smem:[#allocation45_spill]] %s2496_s6 }
   0x6   :  { %2539 = sst [smem:[#allocation46_spill]] %s2497_s7 }
   0x7   :  { %2540 = sst [smem:[#allocation47_spill]] %s2498_s8 }
   0x8   :  { %14 = vsyncpa [#allocation3], 0 }
   0x9   :  { %16 = vsyncpa [#allocation3 + $0x1], 0 }
   0xa   :  { %17 = vsyncpa [#allocation6], 0 }
   0xb   :  { %19 = vsyncpa [#allocation6 + $0x1], 0 }
   0xc   :  { %20 = vsyncpa [#allocation9], 0 }
   0xd   :  { %22 = vsyncpa [#allocation9 + $0x1], 0 }
   0xe   :  { %23 = vsyncpa [#allocation12], 0 }
   0xf   :  { %25 = vsyncpa [#allocation12 + $0x1], 0 }
  0x10   :  { %26 = vsyncpa [#allocation4], 0 }
  0x11   :  { %28 = vsyncpa [#allocation4 + $0x1], 0 }
  0x12   :  { %29 = vsyncpa [#allocation16], 0 }
  0x13   :  { %31 = vsyncpa [#allocation16 + $0x1], 0  ;;  %s1892_s27 = smov 0   ;;  %s1894_s28 = smov 0  }
  0x14   :  { %s1896_s29 = smov 0   ;;  %s1898_s30 = smov 0  }
  0x15   :  { %s1900_s9 = smov 0   ;;  %s1902_s10 = smov 0  }
  0x16   :  { %s1904_s11 = smov 0   ;;  %s1906_s12 = smov 0  }
  0x17   :  { %s1908_s13 = smov 0   ;;  %s1910_s14 = smov 0  }
  0x18   :  { %s1912_s15 = smov 0   ;;  %s1914_s16 = smov 0  }
  0x19   :  { %s1916_s17 = smov 0   ;;  %s1918_s18 = smov 0  }
  0x1a LB: > { %2541 = sst [smem:[#allocation24_spill]] %s1788_s29  ;;  %s1961_s19 = sadd.s32 4294967295, %s1832_s18   ;;  %s1832_s18 = sphi %s1918_s18, %s37_s18   ;;  %s1828_s17 = sphi %s1916_s17, %s2625_s17   ;;  %s1824_s16 = sphi %s1914_s16, %s2619_s16   ;;  %s1820_s15 = sphi %s1912_s15, %s2624_s15   ;;  %s1816_s14 = sphi %s1910_s14, %s2618_s14   ;;  %s1812_s13 = sphi %s1908_s13, %s2617_s13   ;;  %s1808_s12 = sphi %s1906_s12, %s2616_s12   ;;  %s1804_s11 = sphi %s1904_s11, %s2615_s11   ;;  %s1800_s10 = sphi %s1902_s10, %s2614_s10   ;;  %s1796_s9 = sphi %s1900_s9, %s2613_s9   ;;  %s1792_s30 = sphi %s1898_s30, %s2623_s30   ;;  %s1788_s29 = sphi %s1896_s29, %s2611_s29   ;;  %s1784_s28 = sphi %s1894_s28, %s2622_s28   ;;  %s1780_s27 = sphi %s1892_s27, %s2621_s27  }
  0x1b   : > { %2542 = sst [smem:[#allocation25_spill]] %s1796_s9  ;;  %p63_p0 = scmp.ne.s32.totalorder %s1812_s13, %s1808_s12 }
  0x1c   : > { %2543 = sst [smem:[#allocation26_spill]] %s1800_s10  ;;  %p2508_p1 = scmp.eq.s32.totalorder %s1832_s18, 0 }
  0x1d   : > { %2544 = sst [smem:[#allocation27_spill]] %s1808_s12  ;;  %p69_p2 = scmp.ne.s32.totalorder %s1808_s12, %s1804_s11 }
  0x1e   : > { %2545 = sst [smem:[#allocation28_spill]] %s1812_s13  ;;  %p2507_p3 = scmp.eq.s32.totalorder %s1961_s19, 0 }
  0x1f   : > { %2546 = sst [smem:[#allocation29_spill]] %s1816_s14  ;;  %p65_p5 = por %p2508_p1, %p63_p0 }
  0x20   : > { %2547 = sst [smem:[#allocation30_spill]] %s1820_s15  ;;  %p1975_p6 = por %p2507_p3, %p69_p2 }
  0x21   : > { %2548 = sst [smem:[#allocation31_spill]] %s1824_s16  ;;  %p2506_p7 = scmp.lt.s32.totalorder %s1832_s18, 4 }
  0x22   : > { %s2549_s22 = scalar_select %p1975_p6, 1, 0 }
  0x23   : > { %s1981_s23 = sand.u32 1, %s1812_s13   ;;  %s1984_s24 = sand.u32 1, %s1832_s18  }
  0x24   : > { %2550 = sst [smem:[#allocation32_spill]] %s2549_s22  ;;  %p1988_p8 = pnand %p2506_p7, %p65_p5 }
  0x25   : > { %s2505_s26 = sshll.u32 %s1981_s23, 2  ;;  %s2504_s11 = sshll.u32 %s1828_s17, 6 }
  0x26   : > { %s2551_s25 = scalar_select %p1988_p8, 1, 0 }
  0x27   : > { %s2552_s1 = sld [smem:[#allocation41_spill]]  ;;  %s327_s8 = scalar_lea.vmem [#allocation5], %s2505_s26 }
  0x28   : > { %s334_s14 = sshll.u32 %s327_s8, 4  ;;  %p2010_p10 = pneg %p1988_p8  ;;  %s2003_s14 = int_to_ptr.vmem [resolvable:$true] %s334_s14 }
  0x2a   : > { %s2553_s12 = scalar_select %p2010_p10, 1, 0 }
  0x2d   : > { %s1999_s7 = scalar_lea.hbm %s2552_s1, %s2504_s11  ;;  %s1433_s11 = scalar_lea.hbm %s2552_s1, 128 }
  0x2e   : > { %s1428_s22 = scalar_lea.hbm %s1999_s7, 64  ;;  %p1434_p13 = scmp.lt.u32.totalorder %s1999_s7, %s2552_s1 }
  0x2f   : > { %p1429_p9 = scmp.ne.s32.totalorder %s1999_s7, %s1428_s22  ;;  %p1435_p0 = scmp.lt.u32.totalorder %s1433_s11, %s1428_s22 }
  0x30   : > { %p1437_p5 = scmp.lt.u32.totalorder %s1428_s22, %s1999_s7 }
  0x31   : > { %p1431_p11 = pnand %p2010_p10, %p1429_p9  ;;  %p1436_p2 = por %p1435_p0, %p1434_p13 }
  0x33   : > { %p1432_p12 = pneg %p1431_p11  ;;  %p1438_p7 = por %p1437_p5, %p1436_p2 }
  0x35   : > { %p1439_p4 = pnand %p1438_p7, %p1432_p12 }
  0x37   : > { %1442 = shalt.err (!%p1439_p4)
}
  0x38   : > { %s1443_s15 = scalar_lea.vmem %s2003_s14, 64  ;;  %s1834_s20 = smov [#allocation5]  }
  0x39   : > { %p1444_p9 = scmp.ne.s32.totalorder %s2003_s14, %s1443_s15  ;;  %s1448_s21 = sshll.u32 %s1834_s20, 4  ;;  %s1449_s21 = int_to_ptr.vmem [resolvable:$false] %s1448_s21 }
  0x3a   : > { %s1450_s26 = scalar_lea.vmem %s1449_s21, 128  ;;  %p1451_p1 = scmp.lt.s32.totalorder %s2003_s14, %s1449_s21 }
  0x3b   : > { %p1446_p11 = pnand %p1444_p9, %p2010_p10  ;;  %p1452_p6 = scmp.lt.s32.totalorder %s1450_s26, %s1443_s15 }
  0x3d   : > { %p1447_p3 = pneg %p1446_p11  ;;  %p1453_p13 = por %p1452_p6, %p1451_p1 }
  0x3f   : > { %p1454_p0 = pnand %p1453_p13, %p1447_p3 }
  0x41   : > { %1457 = shalt.err (!%p1454_p0)
}
  0x42   : > { %s2554_s22 = scalar_lea.sflag [#allocation6], %s1984_s24  ;;  %s2555_s15 = sshll.u32 %s1828_s17, 6 }
  0x43   : > { %1277 = dma.hbm_to_vmem [thread:$0]  (!%p1988_p8), %s1999_s7, 64, %s2003_s14, %s2554_s22  }
  0x44   : > { %s2040_s20 = scalar_lea.hbm %s2492_s2, %s2555_s15  ;;  %p1172_p1 = scmp.ge.s32.totalorder %s1832_s18, 1 }
  0x45   : > { %p437_p3 = scmp.lt.s32.totalorder %s1832_s18, 5  ;;  %s1153_s26 = sadd.s32 4294967294, %s1832_s18  }
  0x46   : > { %s46_s1 = sadd.s32 1, %s1824_s16  ;;  %s134_s7 = sadd.s32 1, %s1800_s10 }
  0x47   : > { %p2044_p4 = pnand %p1172_p1, %p437_p3  ;;  %p47_p6 = scmp.ge.s32.totalorder %s46_s1, 2 }
  0x48   : > { %p141_p7 = scmp.ne.s32.totalorder %s1800_s10, %s1796_s9  ;;  %p147_p12 = scmp.ne.s32.totalorder %s1796_s9, %s1792_s30 }
  0x49   : > { %s2556_s21 = scalar_select %p2044_p4, 1, 0 }
  0x4a   : > { %s2627_s1 = smov (%p47_p6, %s46_s1), 0  ;;  %s2559_s14 = sadd.s32 1, %s1828_s17 }
  0x4b   : > { %2557 = sst [smem:[#allocation33_spill]] %s2556_s21  ;;  %s2629_s14 = smov (!%p47_p6, %s2559_s14), %s1828_s17 }
  0x4c   : > { %2558 = sst [smem:[#allocation34_spill]] %s2627_s1  ;;  %s131_s22 = ssub.s32 %s1824_s16, %s2627_s1 }
  0x4d   : > { %p2560_p2 = scmp.eq.s32.totalorder %s1832_s18, 0  ;;  %p51_p9 = scmp.ge.s32.totalorder %s2629_s14, 2 }
  0x4e   : > { %p132_p11 = scmp.eq.s32.totalorder %s131_s22, 0  ;;  %p2562_p13 = scmp.eq.s32.totalorder %s1961_s19, 0 }
  0x4f   : > { %p2064_p5 = por %p141_p7, %p2560_p2  ;;  %s240_s11 = sadd.s32 1, %s1788_s29 }
  0x50   : > { %p2070_p0 = por %p147_p12, %p2562_p13  ;;  %s2631_s14 = smov (%p51_p9, %s2629_s14), 0 }
  0x51   : > { %2565 = sst [smem:[#allocation36_spill]] %s2631_s14  ;;  %s53_s1 = ssub.s32 %s1828_s17, %s2631_s14 }
  0x52   : > { %s2563_s30 = scalar_select %p2070_p0, 1, 0 }
  0x53   : > { %s2078_s8 = scalar_select %p132_p11, %s1800_s10, %s134_s7  }
  0x54   : > { %2564 = sst [smem:[#allocation35_spill]] %s2563_s30  ;;  %p250_p1 = scmp.ne.s32.totalorder %s1788_s29, %s1784_s28 }
  0x55   : > { %2566 = sst [smem:[#allocation37_spill]] %s2078_s8  ;;  %p54_p3 = scmp.eq.s32.totalorder %s53_s1, 0 }
  0x56   : > { %s237_s9 = sor.u32 %s131_s22, %s53_s1  ;;  %p2567_p7 = scmp.eq.s32.totalorder %s1961_s19, 3 }
  0x57   : > { %p238_p6 = scmp.eq.s32.totalorder %s237_s9, 0  ;;  %s2569_s30 = sadd.s32 1, %s1812_s13 }
  0x58   : > { %p2086_p2 = por %p2567_p7, %p250_p1  ;;  %p256_p12 = scmp.ne.s32.totalorder %s1784_s28, %s1780_s27 }
  0x59   : > { %s2093_s6 = scalar_select %p54_p3, %s1812_s13, %s2569_s30  }
  0x5a   : > { %s2568_s21 = scalar_select %p2086_p2, 1, 0 }
  0x5b   : > { %2570 = sst [smem:[#allocation38_spill]] %s2093_s6  ;;  %p257_p9 = scmp.eq.s32.totalorder %s1153_s26, 3 }
  0x5c   : > { %s2096_s4 = scalar_select %p238_p6, %s1788_s29, %s240_s11  }
  0x5d   : > { %s361_s7 = sand.u32 1, %s1800_s10   ;;  %s2102_s14 = sshll.u32 %s1824_s16, 8 }
  0x5e   : > { %2571 = sst [smem:[#allocation39_spill]] %s2096_s4  ;;  %p2104_p11 = por %p257_p9, %p256_p12 }
  0x5f   : > { %s2108_s9 = sshll.u32 %s361_s7, 4  ;;  %s2574_s3 = sld [smem:[#allocation42_spill]] }
  0x60   : > { %s2572_s1 = scalar_select %p2104_p11, 1, 0 }
  0x61   : > { %s363_s26 = scalar_lea.vmem [#allocation8], %s2108_s9  ;;  %p2575_p13 = scmp.lt.s32.totalorder %s1832_s18, 4 }
  0x62   : > { %2573 = sst [smem:[#allocation40_spill]] %s2572_s1  ;;  %s370_s11 = sshll.u32 %s363_s26, 4  ;;  %s2125_s11 = int_to_ptr.vmem [resolvable:$true] %s370_s11 }
  0x63   : > { %p2121_p1 = pnand %p2575_p13, %p2064_p5 }
  0x65   : > { %s2114_s30 = scalar_lea.hbm %s2574_s3, %s2102_s14  ;;  %p2132_p6 = pneg %p2121_p1 }
  0x66   : > { %s2576_s16 = scalar_select %p2121_p1, 1, 0 }
  0x67   : > { %s1458_s8 = scalar_lea.hbm %s2114_s30, 256  ;;  %s1463_s6 = scalar_lea.hbm %s2574_s3, 512 }
  0x68   : > { %p1459_p3 = scmp.ne.s32.totalorder %s2114_s30, %s1458_s8  ;;  %p1464_p5 = scmp.lt.u32.totalorder %s2114_s30, %s2574_s3 }
  0x69   : > { %s2577_s22 = scalar_select %p2132_p6, 1, 0 }
  0x6a   : > { %p1461_p7 = pnand %p2132_p6, %p1459_p3  ;;  %p1465_p9 = scmp.lt.u32.totalorder %s1463_s6, %s1458_s8 }
  0x6b   : > { %p1467_p11 = scmp.lt.u32.totalorder %s1458_s8, %s2114_s30 }
  0x6c   : > { %p1462_p12 = pneg %p1461_p7  ;;  %p1466_p13 = por %p1465_p9, %p1464_p5 }
  0x6e   : > { %p1468_p2 = por %p1467_p11, %p1466_p13 }
  0x70   : > { %p1469_p0 = pnand %p1468_p2, %p1462_p12 }
  0x72   : > { %1472 = shalt.err (!%p1469_p0)
}
  0x73   : > { %s1473_s7 = scalar_lea.vmem %s2125_s11, 256  ;;  %s1835_s15 = smov [#allocation8]  }
  0x74   : > { %p1474_p3 = scmp.ne.s32.totalorder %s2125_s11, %s1473_s7  ;;  %s1478_s26 = sshll.u32 %s1835_s15, 4  ;;  %s1479_s26 = int_to_ptr.vmem [resolvable:$false] %s1478_s26 }
  0x75   : > { %s1480_s10 = scalar_lea.vmem %s1479_s26, 512  ;;  %p1481_p8 = scmp.lt.s32.totalorder %s2125_s11, %s1479_s26 }
  0x76   : > { %p1476_p7 = pnand %p1474_p3, %p2132_p6  ;;  %p1482_p10 = scmp.lt.s32.totalorder %s1480_s10, %s1473_s7 }
  0x78   : > { %p1477_p4 = pneg %p1476_p7  ;;  %p1483_p5 = por %p1482_p10, %p1481_p8 }
  0x7a   : > { %p1484_p9 = pnand %p1483_p5, %p1477_p4 }
  0x7c   : > { %1487 = shalt.err (!%p1484_p9)
}
  0x7d   : > { %s2530_s6 = smov 64   ;;  %s1837_s13 = smov 4  }
  0x7e   : > { %s2578_s8 = scalar_lea.sflag [#allocation9], %s1984_s24  ;;  %s2579_s5 = sld [smem:[#allocation44_spill]] }
  0x7f   : > { %1283 = dma.hbm_to_vmem [thread:$0]  (!%p2121_p1), %s2114_s30, 256, %s2125_s11, %s2578_s8, %s2530_s6, %s2530_s6, %s1837_s13  }
  0x80   : > { %s405_s10 = scalar_lea.vmem [#allocation11], %s2108_s9  ;;  %s2529_s4 = scalar_lea.sflag [#allocation12], %s1984_s24 }
  0x81   : > { %s412_s3 = sshll.u32 %s405_s10, 4  ;;  %s2167_s3 = int_to_ptr.vmem [resolvable:$true] %s412_s3 }
  0x84   : > { %s2164_s26 = scalar_lea.hbm %s2579_s5, %s2102_s14  ;;  %s1493_s8 = scalar_lea.hbm %s2579_s5, 512 }
  0x85   : > { %s1488_s29 = scalar_lea.hbm %s2164_s26, 256  ;;  %p1494_p0 = scmp.lt.u32.totalorder %s2164_s26, %s2579_s5 }
  0x86   : > { %p1489_p8 = scmp.ne.s32.totalorder %s2164_s26, %s1488_s29  ;;  %p1495_p2 = scmp.lt.u32.totalorder %s1493_s8, %s1488_s29 }
  0x87   : > { %p1497_p12 = scmp.lt.u32.totalorder %s1488_s29, %s2164_s26 }
  0x88   : > { %p1491_p10 = pnand %p1489_p8, %p2132_p6  ;;  %p1496_p11 = por %p1495_p2, %p1494_p0 }
  0x8a   : > { %p1492_p4 = pneg %p1491_p10  ;;  %p1498_p13 = por %p1497_p12, %p1496_p11 }
  0x8c   : > { %p1499_p3 = pnand %p1498_p13, %p1492_p4 }
  0x8e   : > { %1502 = shalt.err (!%p1499_p3)
}
  0x8f   : > { %s1503_s10 = scalar_lea.vmem %s2167_s3, 256  ;;  %s1838_s30 = smov [#allocation11]  }
  0x90   : > { %p1504_p7 = scmp.ne.s32.totalorder %s2167_s3, %s1503_s10  ;;  %s1508_s11 = sshll.u32 %s1838_s30, 4  ;;  %s1509_s11 = int_to_ptr.vmem [resolvable:$false] %s1508_s11 }
  0x91   : > { %s1510_s7 = scalar_lea.vmem %s1509_s11, 512  ;;  %p1511_p8 = scmp.lt.s32.totalorder %s2167_s3, %s1509_s11 }
  0x92   : > { %p1506_p5 = pnand %p1504_p7, %p2132_p6  ;;  %p1512_p10 = scmp.lt.s32.totalorder %s1510_s7, %s1503_s10 }
  0x94   : > { %p1507_p9 = pneg %p1506_p5  ;;  %p1513_p0 = por %p1512_p10, %p1511_p8 }
  0x96   : > { %p1514_p2 = pnand %p1513_p0, %p1507_p9 }
  0x98   : > { %1517 = shalt.err (!%p1514_p2)
}
  0x99   : > { %1289 = dma.hbm_to_vmem [thread:$0]  (!%p2121_p1), %s2164_s26, 256, %s2167_s3, %s2529_s4, %s2530_s6, %s2530_s6, %s1837_s13  }
  0x9a   : > { %s1156_s29 = sshll.u32 %s1981_s23, 3  ;;  %s1157_s8 = sshll.u32 %s1828_s17, 7 }
  0x9b   : > { %s2201_s30 = scalar_lea.hbm %s2490_s0, %s1157_s8  ;;  %s309_s11 = scalar_lea.vmem [#allocation2], %s1156_s29 }
  0x9c   : > { %s316_s7 = sshll.u32 %s309_s11, 4  ;;  %s2580_s5 = sshll.u32 %s1981_s23, 2  ;;  %s2203_s7 = int_to_ptr.vmem [resolvable:$true] %s316_s7 }
  0x9d   : > { %s2207_s1 = scalar_lea.vmem [#allocation7], %s2580_s5  ;;  %s306_s26 = scalar_lea.sflag [#allocation3], %s1981_s23 }
  0x9e   : > { %s352_s3 = sshll.u32 %s2207_s1, 4  ;;  %s1518_s4 = scalar_lea.hbm %s2201_s30, 128  ;;  %s353_s3 = int_to_ptr.vmem [resolvable:$true] %s352_s3 }
  0x9f   : > { %p1519_p4 = scmp.ne.s32.totalorder %s2201_s30, %s1518_s4  ;;  %p2581_p11 = scmp.ne.s32.totalorder %s2553_s12, 0 }
  0xa0   : > { %s1523_s10 = scalar_lea.hbm %s2490_s0, 256  ;;  %p1524_p3 = scmp.lt.u32.totalorder %s2201_s30, %s2490_s0 }
  0xa1   : > { %p1521_p12 = pnand %p1519_p4, %p2581_p11  ;;  %p1525_p7 = scmp.lt.u32.totalorder %s1523_s10, %s1518_s4 }
  0xa2   : > { %p1527_p9 = scmp.lt.u32.totalorder %s1518_s4, %s2201_s30 }
  0xa3   : > { %p1522_p13 = pneg %p1521_p12  ;;  %p1526_p5 = por %p1525_p7, %p1524_p3 }
  0xa5   : > { %p1528_p8 = por %p1527_p9, %p1526_p5 }
  0xa7   : > { %p1529_p10 = pnand %p1528_p8, %p1522_p13 }
  0xa9   : > { %1532 = shalt.err (!%p1529_p10)
}
  0xaa   : > { %s1533_s5 = scalar_lea.vmem %s2203_s7, 128  ;;  %s1839_s11 = smov [#allocation2]  }
  0xab   : > { %p1534_p0 = scmp.ne.s32.totalorder %s2203_s7, %s1533_s5  ;;  %s1538_s8 = sshll.u32 %s1839_s11, 4  ;;  %s1539_s8 = int_to_ptr.vmem [resolvable:$false] %s1538_s8 }
  0xac   : > { %s1540_s6 = scalar_lea.vmem %s1539_s8, 256  ;;  %p1541_p12 = scmp.lt.s32.totalorder %s2203_s7, %s1539_s8 }
  0xad   : > { %p1536_p2 = pnand %p1534_p0, %p2581_p11  ;;  %p1542_p1 = scmp.lt.s32.totalorder %s1540_s6, %s1533_s5 }
  0xaf   : > { %p1537_p4 = pneg %p1536_p2  ;;  %p1543_p3 = por %p1542_p1, %p1541_p12 }
  0xb1   : > { %p1544_p7 = pnand %p1543_p3, %p1537_p4 }
  0xb3   : > { %1547 = shalt.err (!%p1544_p7)
}
  0xb4   : > { %p2582_p13 = scmp.ne.s32.totalorder %s2551_s25, 0  ;;  %s1548_s4 = scalar_lea.hbm %s2040_s20, 64 }
  0xb5   : > { %p1549_p5 = scmp.ne.s32.totalorder %s2040_s20, %s1548_s4  ;;  %s1553_s29 = scalar_lea.hbm %s2492_s2, 128 }
  0xb6   : > { %1274 = dma.hbm_to_vmem [thread:$0]  (!%p2582_p13), %s2201_s30, 128, %s2203_s7, %s306_s26  }
  0xb7   : > { %p1551_p9 = pnand %p1549_p5, %p2581_p11  ;;  %p1554_p8 = scmp.lt.u32.totalorder %s2040_s20, %s2492_s2 }
  0xb8   : > { %p1555_p10 = scmp.lt.u32.totalorder %s1553_s29, %s1548_s4  ;;  %p1557_p2 = scmp.lt.u32.totalorder %s1548_s4, %s2040_s20 }
  0xb9   : > { %p1552_p1 = pneg %p1551_p9 }
  0xba   : > { %p1556_p0 = por %p1555_p10, %p1554_p8 }
  0xbc   : > { %p1558_p4 = por %p1557_p2, %p1556_p0 }
  0xbe   : > { %p1559_p12 = pnand %p1558_p4, %p1552_p1 }
  0xc0   : > { %1562 = shalt.err (!%p1559_p12)
}
  0xc1   : > { %s1563_s1 = scalar_lea.vmem %s353_s3, 64  ;;  %s1840_s30 = smov [#allocation7]  }
  0xc2   : > { %p1564_p3 = scmp.ne.s32.totalorder %s353_s3, %s1563_s1  ;;  %s1568_s7 = sshll.u32 %s1840_s30, 4  ;;  %s1569_s7 = int_to_ptr.vmem [resolvable:$false] %s1568_s7 }
  0xc3   : > { %s1570_s26 = scalar_lea.vmem %s1569_s7, 128  ;;  %p1571_p9 = scmp.lt.s32.totalorder %s353_s3, %s1569_s7 }
  0xc4   : > { %p1566_p7 = pnand %p1564_p3, %p2581_p11  ;;  %p1572_p6 = scmp.lt.s32.totalorder %s1570_s26, %s1563_s1 }
  0xc6   : > { %p1567_p5 = pneg %p1566_p7  ;;  %p1573_p13 = por %p1572_p6, %p1571_p9 }
  0xc8   : > { %p1574_p8 = pnand %p1573_p13, %p1567_p5 }
  0xca   : > { %1577 = shalt.err (!%p1574_p8)
}
  0xcb   : > { %p2583_p10 = scmp.ne.s32.totalorder %s2551_s25, 0  ;;  %s2584_s8 = scalar_lea.sflag [#allocation6], %s1984_s24 }
  0xcc   : > { %s2585_s15 = sld [smem:[#allocation43_spill]]  ;;  %s384_s29 = scalar_lea.vmem [#allocation10], %s2108_s9 }
  0xcd   : > { %1280 = dma.hbm_to_vmem [thread:$0]  (!%p2583_p10), %s2040_s20, 64, %s353_s3, %s2584_s8  }
  0xce   : > { %s391_s11 = sshll.u32 %s384_s29, 4  ;;  %p2587_p13 = scmp.ne.s32.totalorder %s2577_s22, 0  ;;  %s2260_s11 = int_to_ptr.vmem [resolvable:$true] %s391_s11 }
  0xd2   : > { %s2586_s5 = smov %s2585_s15  ;;  %s2257_s10 = scalar_lea.hbm %s2585_s15, %s2102_s14 }
  0xd3   : > { %s1578_s1 = scalar_lea.hbm %s2257_s10, 256  ;;  %s1583_s3 = scalar_lea.hbm %s2586_s5, 512 }
  0xd4   : > { %p1579_p6 = scmp.ne.s32.totalorder %s2257_s10, %s1578_s1  ;;  %p1584_p2 = scmp.lt.u32.totalorder %s2257_s10, %s2586_s5 }
  0xd5   : > { %p1585_p4 = scmp.lt.u32.totalorder %s1583_s3, %s1578_s1  ;;  %p1587_p3 = scmp.lt.u32.totalorder %s1578_s1, %s2257_s10 }
  0xd6   : > { %p1581_p1 = pnand %p1579_p6, %p2587_p13 }
  0xd7   : > { %p1586_p12 = por %p1585_p4, %p1584_p2 }
  0xd8   : > { %p1582_p0 = pneg %p1581_p1 }
  0xd9   : > { %p1588_p7 = por %p1587_p3, %p1586_p12 }
  0xdb   : > { %p1589_p5 = pnand %p1588_p7, %p1582_p0 }
  0xdd   : > { %1592 = shalt.err (!%p1589_p5)
}
  0xde   : > { %s1593_s9 = scalar_lea.vmem %s2260_s11, 256  ;;  %s1841_s26 = smov [#allocation10]  }
  0xdf   : > { %p1594_p9 = scmp.ne.s32.totalorder %s2260_s11, %s1593_s9  ;;  %s1598_s8 = sshll.u32 %s1841_s26, 4  ;;  %s1599_s8 = int_to_ptr.vmem [resolvable:$false] %s1598_s8 }
  0xe0   : > { %s1600_s6 = scalar_lea.vmem %s1599_s8, 512  ;;  %p1601_p1 = scmp.lt.s32.totalorder %s2260_s11, %s1599_s8 }
  0xe1   : > { %p1596_p8 = pnand %p1594_p9, %p2587_p13  ;;  %p1602_p10 = scmp.lt.s32.totalorder %s1600_s6, %s1593_s9 }
  0xe3   : > { %p1597_p6 = pneg %p1596_p8  ;;  %p1603_p2 = por %p1602_p10, %p1601_p1 }
  0xe5   : > { %p1604_p4 = pnand %p1603_p2, %p1597_p6 }
  0xe7   : > { %1607 = shalt.err (!%p1604_p4)
}
  0xe8   : > { %p2588_p0 = scmp.ne.s32.totalorder %s2576_s16, 0  ;;  %s2589_s4 = smov 64  }
  0xe9   : > { %s2590_s15 = scalar_lea.sflag [#allocation9], %s1984_s24  ;;  %s1171_s22 = sshll.u32 %s1828_s17, 4 }
  0xea   : > { %1286 = dma.hbm_to_vmem [thread:$0]  (!%p2588_p0), %s2257_s10, 256, %s2260_s11, %s2590_s15, %s2589_s4, %s2589_s4, %s1837_s13  }
  0xeb   : > { %s425_s29 = scalar_lea.vmem [#allocation13], %s1981_s23  ;;  %s2591_s3 = sld [smem:[#allocation45_spill]] }
  0xec   : > { %s432_s1 = sshll.u32 %s425_s29, 4  ;;  %s433_s1 = int_to_ptr.vmem [resolvable:$true] %s432_s1 }
  0xf1   : > { %s430_s7 = scalar_lea.hbm %s2591_s3, %s1171_s22  ;;  %s1613_s26 = scalar_lea.hbm %s2591_s3, 32 }
  0xf2   : > { %s1608_s16 = scalar_lea.hbm %s430_s7, 16  ;;  %p1614_p3 = scmp.lt.u32.totalorder %s430_s7, %s2591_s3 }
  0xf3   : > { %p1609_p10 = scmp.ne.s32.totalorder %s430_s7, %s1608_s16  ;;  %p1615_p7 = scmp.lt.u32.totalorder %s1613_s26, %s1608_s16 }
  0xf4   : > { %p1617_p9 = scmp.lt.u32.totalorder %s1608_s16, %s430_s7 }
  0xf5   : > { %p1611_p13 = pnand %p1609_p10, %p2581_p11  ;;  %p1616_p5 = por %p1615_p7, %p1614_p3 }
  0xf7   : > { %p1612_p12 = pneg %p1611_p13  ;;  %p1618_p8 = por %p1617_p9, %p1616_p5 }
  0xf9   : > { %p1619_p6 = pnand %p1618_p8, %p1612_p12 }
  0xfb   : > { %1622 = shalt.err (!%p1619_p6)
}
  0xfc   : > { %s1623_s23 = scalar_lea.vmem %s433_s1, 16  ;;  %s1842_s13 = smov [#allocation13]  }
  0xfd   : > { %p1624_p1 = scmp.ne.s32.totalorder %s433_s1, %s1623_s23  ;;  %s1628_s10 = sshll.u32 %s1842_s13, 4  ;;  %s1629_s10 = int_to_ptr.vmem [resolvable:$false] %s1628_s10 }
  0xfe   : > { %s1630_s11 = scalar_lea.vmem %s1629_s10, 32  ;;  %p1631_p0 = scmp.lt.s32.totalorder %s433_s1, %s1629_s10 }
  0xff   : > { %p1626_p2 = pnand %p1624_p1, %p2581_p11  ;;  %p1632_p10 = scmp.lt.s32.totalorder %s1630_s11, %s1623_s23 }
 0x101   : > { %p1627_p4 = pneg %p1626_p2  ;;  %p1633_p13 = por %p1632_p10, %p1631_p0 }
 0x103   : > { %p1634_p3 = pnand %p1633_p13, %p1627_p4 }
 0x105   : > { %1637 = shalt.err (!%p1634_p3)
}
 0x106   : > { %p2592_p7 = scmp.ne.s32.totalorder %s2551_s25, 0  ;;  %s2593_s4 = scalar_lea.sflag [#allocation12], %s1984_s24 }
 0x107   : > { %s2594_s15 = sld [smem:[#allocation33_spill]] }
 0x108   : > { %1292 = dma.hbm_to_vmem [thread:$0]  (!%p2592_p7), %s430_s7, 16, %s433_s1, %s2593_s4  }
 0x10d   : > { %p2595_p12 = scmp.ne.s32.totalorder %s2594_s15, 0 }
 0x10e   : > { %s2596_s12 = sld [smem:[#allocation27_spill]] (!%p2595_p12)  ;;  %s2597_s22 = sld [smem:[#allocation32_spill]] (!%p2595_p12) }
 0x10f   : > { %441 = sbr.rel (%p2595_p12) target bundleno = 1288 (0x508), region = 48 }
 0x114   : > { %s2310_s29 = sand.u32 (!%p2595_p12), 1, %s2596_s12   ;;  %p2598_p11 = scmp.ne.s32.totalorder (!%p2595_p12), %s2597_s22, 0 }
 0x115   : > { %s1173_s30 = sshll.u32 (!%p2595_p12), %s2310_s29, 3  ;;  %s444_s20 = scalar_lea.sflag (!%p2595_p12), [#allocation3], %s2310_s29 }
 0x116   : > { %s2314_s16 = scalar_lea.vmem [#allocation2], %s1173_s30 }
 0x117   : > { %1751 = dma.done.wait (%p2598_p11), %s444_s20, 128  }
 0x118   : > { %1753 = vsyncadd (%p2598_p11), %s444_s20, 4294967168  ;;  %s452_s24 = sand.u32 1, %s1961_s19   ;;  %s1174_s25 = sshll.u32 %s2310_s29, 2 }
 0x119   : > { %s453_s1 = scalar_lea.sflag [#allocation6], %s452_s24  ;;  %s2322_s7 = scalar_lea.vmem [#allocation5], %s1174_s25 }
 0x11a   : > { %1755 = dma.done.wait (%p2598_p11), %s453_s1, 128  }
 0x11b   : > { %1757 = vsyncadd (%p2598_p11), %s453_s1, 4294967168  ;;  %s2599_s14 = sld [smem:[#allocation25_spill]]  ;;  %s2600_s9 = sld [smem:[#allocation35_spill]] }
 0x11c   : > { %s2331_s6 = scalar_lea.vmem [#allocation7], %s1174_s25  ;;  %s471_s23 = scalar_lea.sflag [#allocation9], %s452_s24 }
 0x121   : > { %s472_s26 = sand.u32 1, %s2599_s14   ;;  %p2601_p5 = scmp.ne.s32.totalorder %s2600_s9, 0 }
 0x122   : > { %s2329_s8 = sshll.u32 %s472_s26, 4 }
 0x123   : > { %s474_s13 = scalar_lea.vmem [#allocation8], %s2329_s8 }
 0x124   : > { %1759 = dma.done.wait (%p2601_p5), %s471_s23, 512  }
 0x125   : > { %1761 = vsyncadd (%p2601_p5), %s471_s23, 4294966784  ;;  %s483_s19 = scalar_lea.vmem [#allocation10], %s2329_s8  ;;  %s489_s10 = scalar_lea.sflag [#allocation12], %s452_s24 }
 0x126   : > { %s492_s11 = scalar_lea.vmem [#allocation11], %s2329_s8 }
 0x127   : > { %1763 = dma.done.wait (%p2601_p5), %s489_s10, 256  }
 0x128   : > { %1765 = vsyncadd (%p2601_p5), %s489_s10, 4294967040  ;;  %s500_s4 = scalar_lea.vmem [#allocation13], %s2310_s29 }
 0x129   : > { %1767 = dma.done.wait (%p2598_p11), %s489_s10, 16  }
 0x12a   : > { %1769 = vsyncadd (%p2598_p11), %s489_s10, 4294967280  ;;  %v1843_v0 = vmov 0.0   ;;  %vm1844_vm0 = vmmov 0   ;;  %v1418_v1 = vld [vmem:[%s483_s19] sm:$0xff]   ;;  %v1420_v3 = vld [vmem:[%s483_s19 + $0x8] sm:$0xff]   ;;  %vm596_vm1 = vcmask 261120  }
 0x12b   : > { %1225 = vmatprep.subr.bf16.mxu1 %v1843_v0  ;;  %1217 = vmatprep.subr.bf16.mxu0 %v1843_v0  ;;  %v1419_v2 = vld [vmem:[%s474_s13] sm:$0xff]   ;;  %v1421_v4 = vld [vmem:[%s474_s13 + $0x8] sm:$0xff]   ;;  %vm761_vm2 = vcmask 130048   ;;  %vm808_vm3 = vcmask 64512   ;;  %s2602_s15 = sld [smem:[#allocation30_spill]]  ;;  %s2603_s12 = sld [smem:[#allocation29_spill]] }
 0x12c   : > { %1229 = vmatprep.mubr.msk.bf16.mxu1 %vm1844_vm0, %v1843_v0  ;;  %1221 = vmatprep.mubr.msk.bf16.mxu0 %vm1844_vm0, %v1843_v0  ;;  %v568_v5 = vld [vmem:[%s2314_s16] sm:$0xff]  ;;  %v570_v6 = vld [vmem:[%s2322_s7] sm:$0xf]  ;;  %v1423_v21 = vld [vmem:[%s492_s11 + $0x8] sm:$0xff]   ;;  %vm826_vm4 = vcmask 1043456   ;;  %s2369_s22 = sand.u32 1, %s1784_s28  }
 0x12d   : > { %1226 = vmatpush3.bf16.msra.mxu1 %v1418_v1  ;;  %1218 = vmatpush3.bf16.msra.mxu0 %v1419_v2  ;;  %v569_v7 = vpack.c.bf16 %v568_v5, %v568_v5  ;;  %v1422_v20 = vld [vmem:[%s492_s11] sm:$0xff]   ;;  %v571_v22 = vld [vmem:[%s2331_s6] sm:$0xf]  ;;  %s1179_s29 = sshll.u32 %s2369_s22, 2  ;;  %vm821_vm5 = vcmask 60416   ;;  %s2604_s7 = sld [smem:[#allocation47_spill]] }
 0x12e   : > { %1227 = vmatprep.subr.bf16.mxu1 %v1843_v0  ;;  %1219 = vmatprep.subr.bf16.mxu0 %v1843_v0  ;;  %v1190_v23 = vld [vmem:[%s500_s4] ss:$0 sm:$0xff]  ;;  %s566_s30 = scalar_lea.vmem [#allocation15], %s1179_s29  ;;  %s879_s26 = scalar_lea.sflag [#allocation16], %s2369_s22 }
 0x12f   : > { %s909_s9 = sshll.u32 %s566_s30, 4  ;;  %p2605_p8 = scmp.ne.s32.totalorder %s2568_s21, 0  ;;  %s910_s9 = int_to_ptr.vmem [resolvable:$true] %s909_s9 }
 0x130   : > { %s1638_s8 = scalar_lea.vmem %s910_s9, 64  ;;  %s1845_s6 = smov [#allocation15]  }
 0x131   : > { %1228 = vmatpush3.bf16.msra.mxu1 %v1420_v3  ;;  %1220 = vmatpush3.bf16.msra.mxu0 %v1421_v4  ;;  %s1195_s20 = sshll.u32 %s2602_s15, 1  ;;  %p1639_p9 = scmp.ne.s32.totalorder %s910_s9, %s1638_s8 }
 0x132   : > { %1241 = vmatprep.subr.bf16.mxu1 %v1843_v0  ;;  %1233 = vmatprep.subr.bf16.mxu0 %v1843_v0  ;;  %s2377_s16 = sadd.s32 %s2603_s12, %s1195_s20  ;;  %s1642_s23 = sshll.u32 %s1845_s6, 4  ;;  %s1643_s23 = int_to_ptr.vmem [resolvable:$false] %s1642_s23 }
 0x133   : > { %s1196_s24 = sshll.u32 %s2377_s16, 6  ;;  %p1640_p6 = pnand %p1639_p9, %p2605_p8 }
 0x134   : > { %1230 = vmatmul.mubr.msk.bf16.vlgmr.msra.gmra.mrb[0].mxu1 %vm596_vm1, %v570_v6  ;;  %1222 = vmatmul.mubr.msk.bf16.vlgmr.msra.gmra.mrb[0].mxu0 %vm596_vm1, %v569_v7  ;;  %s2385_s14 = scalar_lea.hbm %s2604_s7, %s1196_s24  ;;  %s1644_s13 = scalar_lea.vmem %s1643_s23, 128 }
 0x135   : > { %1243 = vmatprep.mubr.msk.bf16.mxu1 %vm1844_vm0, %v1843_v0  ;;  %1237 = vmatprep.mubr.msk.bf16.mxu0 %vm1844_vm0, %v1843_v0  ;;  %p1641_p1 = pneg %p1640_p6  ;;  %p1645_p2 = scmp.lt.s32.totalorder %s910_s9, %s1643_s23 }
 0x136   : > { %1234 = vmatpush3.bf16.msra.mxu0 %v1422_v20  ;;  %p1646_p4 = scmp.lt.s32.totalorder %s1644_s13, %s1638_s8 }
 0x137   : > { %1235 = vmatprep.subr.bf16.mxu0 %v1843_v0 }
 0x138   : > { %p1647_p0 = por %p1646_p4, %p1645_p2 }
 0x13a   : > { %1236 = vmatpush3.bf16.msra.mxu0 %v1423_v21  ;;  %p1648_p10 = pnand %p1647_p0, %p1641_p1 }
 0x13b   : > { %1247 = vmatprep.subr.bf16.mxu0 %v1843_v0 }
 0x13d   : > { %1238 = vmatmul.mubr.msk.bf16.vlgmr.msra.gmra.mrb[4].mxu0 %vm596_vm1, %v571_v22 }
 0x13e   : > { %1249 = vmatprep.mubr.msk.bf16.mxu0 %vm1844_vm0, %v1843_v0 }
 0x207   : > { %v691_v8 = vpop.f32.mrb[0].mxu1  ;;  %v634_v11 = vpop.f32.mrb[0].mxu0 }
 0x208   : > { %v697_v9 = vpack.c.bf16 %v691_v8, %v691_v8  ;;  %v1231_v10 = vpop.f32.mrb[1].mxu1  ;;  %v1223_v13 = vpop.f32.mrb[1].mxu0  ;;  %v640_v16 = vmul.f32 0.25, %v634_v11 }
 0x209   : > { %v694_v12 = vpop.f32.mrb[2].mxu1  ;;  %v637_v17 = vpop.f32.mrb[2].mxu0 }
 0x20a   : > { %v766_v14 = vsel %vm761_vm2, %v697_v9, 0  ;;  %v1232_v15 = vpop.f32.mrb[3].mxu1  ;;  %v1224_v18 = vpop.f32.mrb[3].mxu0  ;;  %v641_v19 = vpack.c.bf16 %v640_v16, %v640_v16 }
 0x20b   : > { %1242 = vmatpush3.bf16.xpose.msra.mxu1 %v766_v14 }
 0x210   : > { %v747_v35 = vpop.f32.mrb[4].mxu0 }
 0x211   : > { %v1239_v36 = vpop.f32.mrb[5].mxu0  ;;  %v753_v39 = vpack.c.bf16 %v747_v35, %v747_v35 }
 0x212   : > { %1244 = vmatmul.mubr.msk.bf16.vlgmr.msra.gmra.mrb[4].mxu1 %vm761_vm2, %v641_v19  ;;  %v750_v37 = vpop.f32.mrb[6].mxu0 }
 0x213   : > { %v1240_v38 = vpop.f32.mrb[7].mxu0  ;;  %v828_v40 = vsel %vm826_vm4, %v753_v39, 0 }
 0x214   : > { %1248 = vmatpush3.bf16.msra.mxu0 %v828_v40 }
 0x2e5   : > { %v802_v24 = vpop.f32.mrb[4].mxu1 }
 0x2e6   : > { %v803_v25 = vadd.f32 %v1190_v23, %v802_v24  ;;  %v1245_v26 = vpop.f32.mrb[5].mxu1 }
 0x2e7   : > { %v805_v27 = vpop.f32.mrb[6].mxu1 }
 0x2e8   : > { %v1246_v28 = vpop.f32.mrb[7].mxu1  ;;  %v809_v29 = vsel %vm808_vm3, %v803_v25, -inf }
 0x2e9   : > { %810 = vmax.xlane.f32.xlu0 %v809_v29 }
 0x376   : > { %v811_v30 = vpop.xlane.xlu0 %810 }
 0x377   : > { %v812_v31 = vsub.f32 %v803_v25, %v811_v30 }
 0x379   : > { %v813_v32 = vmul.f32 1.442695, %v812_v31 }
 0x37b   : > { %1424 = vpow2.f32 %v813_v32 }
 0x385   : > { %v1425_v33 = vpop.eup %1424 }
 0x386   : > { %v815_v34 = vsel %vm808_vm3, %v1425_v33, 0.0 }
 0x387   : > { %816 = vadd.xlane.f32.xlu0 %v815_v34 }
 0x414   : > { %v817_v41 = vpop.xlane.xlu0 %816 }
 0x415   : > { %1426 = vrcp.f32 %v817_v41 }
 0x41f   : > { %v1427_v42 = vpop.eup %1426 }
 0x420   : > { %v819_v43 = vmul.f32 %v1427_v42, %v1425_v33 }
 0x422   : > { %v820_v44 = vpack.c.bf16 %v819_v43, %v819_v43 }
 0x424   : > { %1250 = vmatmul.mubr.msk.bf16.vlgmr.msra.gmra.mrb[8].mxu0 %vm808_vm3, %v820_v44  ;;  %822 = vst.msk [vmem:[%s566_s30] sm:$0xf] %vm821_vm5, %v820_v44 }
 0x425   : > { %1651 = shalt.err (!%p1648_p10)
}
 0x426   : > { %s1652_s19 = scalar_lea.hbm %s2385_s14, 64  ;;  %s1656_s4 = scalar_lea.hbm %s2604_s7, 256 }
 0x427   : > { %p1653_p13 = scmp.ne.s32.totalorder %s2385_s14, %s1652_s19  ;;  %p1657_p12 = scmp.lt.u32.totalorder %s2385_s14, %s2604_s7 }
 0x428   : > { %p1658_p11 = scmp.lt.u32.totalorder %s1656_s4, %s1652_s19  ;;  %p1660_p9 = scmp.lt.u32.totalorder %s1652_s19, %s2385_s14 }
 0x429   : > { %p1654_p3 = pnand %p1653_p13, %p2605_p8 }
 0x42a   : > { %p1659_p5 = por %p1658_p11, %p1657_p12 }
 0x42b   : > { %p1655_p7 = pneg %p1654_p3 }
 0x42c   : > { %p1661_p6 = por %p1660_p9, %p1659_p5 }
 0x42e   : > { %p1662_p1 = pnand %p1661_p6, %p1655_p7 }
 0x430   : > { %1665 = shalt.err (!%p1662_p1)
}
 0x431   : > { %1268 = dma.vmem_to_hbm [thread:$0]  (%p2605_p8), %s910_s9, 64, %s2385_s14, %s879_s26   ;;  %vm871_vm6 = vcmask 125952  }
 0x432   : > { %s559_s30 = scalar_lea.vmem [#allocation14], %s1179_s29  ;;  %s2606_s8 = sld [smem:[#allocation46_spill]] }
 0x433   : > { %s894_s20 = sshll.u32 %s559_s30, 4  ;;  %s874_s29 = scalar_lea.sflag [#allocation4], %s2369_s22  ;;  %s2414_s20 = int_to_ptr.vmem [resolvable:$true] %s894_s20 }
 0x434   : > { %s1666_s14 = scalar_lea.vmem %s2414_s20, 64  ;;  %s1846_s16 = smov [#allocation14]  }
 0x435   : > { %p1667_p2 = scmp.ne.s32.totalorder %s2414_s20, %s1666_s14  ;;  %s1670_s9 = sshll.u32 %s1846_s16, 4  ;;  %s1671_s9 = int_to_ptr.vmem [resolvable:$false] %s1670_s9 }
 0x436   : > { %s1672_s26 = scalar_lea.vmem %s1671_s9, 128  ;;  %p1673_p10 = scmp.lt.s32.totalorder %s2414_s20, %s1671_s9 }
 0x437   : > { %p1668_p4 = pnand %p1667_p2, %p2605_p8  ;;  %p1674_p13 = scmp.lt.s32.totalorder %s1672_s26, %s1666_s14 }
 0x438   : > { %s2412_s6 = scalar_lea.hbm %s2606_s8, %s1196_s24 }
 0x439   : > { %p1669_p0 = pneg %p1668_p4  ;;  %p1675_p3 = por %p1674_p13, %p1673_p10 }
 0x43b   : > { %p1676_p7 = pnand %p1675_p3, %p1669_p0 }
 0x4f7   : > { %v864_v45 = vpop.f32.mrb[8].mxu0 }
 0x4f8   : > { %v870_v46 = vpack.c.bf16 %v864_v45, %v864_v45  ;;  %v1251_v47 = vpop.f32.mrb[9].mxu0 }
 0x4f9   : > { %v867_v48 = vpop.f32.mrb[10].mxu0 }
 0x4fa   : > { %v1252_v49 = vpop.f32.mrb[11].mxu0  ;;  %872 = vst.msk [vmem:[%s559_s30] sm:$0xf] %vm871_vm6, %v870_v46 }
 0x4fb   : > { %1679 = shalt.err (!%p1676_p7)
}
 0x4fc   : > { %s1680_s22 = scalar_lea.hbm %s2412_s6, 64  ;;  %s1684_s13 = scalar_lea.hbm %s2606_s8, 256 }
 0x4fd   : > { %p1681_p12 = scmp.ne.s32.totalorder %s2412_s6, %s1680_s22  ;;  %p1685_p9 = scmp.lt.u32.totalorder %s2412_s6, %s2606_s8 }
 0x4fe   : > { %p1686_p6 = scmp.lt.u32.totalorder %s1684_s13, %s1680_s22  ;;  %p1688_p2 = scmp.lt.u32.totalorder %s1680_s22, %s2412_s6 }
 0x4ff   : > { %p1682_p11 = pnand %p1681_p12, %p2605_p8 }
 0x500   : > { %p1687_p1 = por %p1686_p6, %p1685_p9 }
 0x501   : > { %p1683_p5 = pneg %p1682_p11 }
 0x502   : > { %p1689_p4 = por %p1688_p2, %p1687_p1 }
 0x504   : > { %p1690_p0 = pnand %p1689_p4, %p1683_p5 }
 0x506   : > { %1693 = shalt.err (!%p1690_p0)
}
 0x507   : > { %1267 = dma.vmem_to_hbm [thread:$0]  (%p2605_p8), %s2414_s20, 64, %s2412_s6, %s874_s29  }
 0x508 PF: > { %s2607_s11 = sld [smem:[#allocation40_spill]]  ;;  %p1301_p10 = scmp.ge.s32.totalorder %s1832_s18, 2 }
 0x509   : > { %s921_s4 = sand.u32 1, %s1780_s27  }
 0x50a   : > { %s922_s15 = scalar_lea.sflag [#allocation4], %s921_s4 }
 0x50e   : > { %p2608_p13 = scmp.ne.s32.totalorder %s2607_s11, 0 }
 0x510   : > { %p1294_p3 = pnand %p1301_p10, %p2608_p13 }
 0x512   : > { %1771 = dma.done.wait (!%p1294_p3), %s922_s15, 64  }
 0x513   : > { %1773 = vsyncadd (!%p1294_p3), %s922_s15, 4294967232  ;;  %s931_s12 = scalar_lea.sflag [#allocation16], %s921_s4 }
 0x514   : > { %1775 = dma.done.wait (!%p1294_p3), %s931_s12, 64  }
 0x515   : > { %1777 = vsyncadd (!%p1294_p3), %s931_s12, 4294967232  ;;  %s37_s18 = sadd.s32 1, %s1832_s18   ;;  %s2610_s30 = sld [smem:[#allocation24_spill]] }
 0x516   : > { %p2443_p7 = scmp.ge.s32.totalorder %s37_s18, 6   ;;  %s2611_s29 = sld [smem:[#allocation39_spill]] }
 0x517   : > { %s2612_s20 = sld [smem:[#allocation25_spill]]  ;;  %s2613_s9 = sld [smem:[#allocation26_spill]] }
 0x518   : > { %s2614_s10 = sld [smem:[#allocation37_spill]]  ;;  %s2615_s11 = sld [smem:[#allocation27_spill]] }
 0x519   : > { %s2616_s12 = sld [smem:[#allocation28_spill]]  ;;  %s2617_s13 = sld [smem:[#allocation38_spill]] }
 0x51a   : > { %s2618_s14 = sld [smem:[#allocation31_spill]]  ;;  %s2619_s16 = sld [smem:[#allocation34_spill]] }
 0x51b   : > { %s2620_s25 = sld [smem:[#allocation36_spill]]  ;;  %s2621_s27 = smov %s1784_s28 }
 0x51c   : > { %s2622_s28 = smov %s2610_s30  ;;  %s2624_s15 = smov %s1828_s17 }
 0x51d   : > { %s2623_s30 = smov %s2612_s20  ;;  %36 = sbr.rel (!%p2443_p7) target bundleno = 26 (0x1a), region = 182 }
 0x521   : > { %s2625_s17 = smov %s2620_s25 }
 0x524   :  { %936 = vsyncpa [#allocation3], 1 }
 0x525   :  { %938 = vsyncpa [#allocation3 + $0x1], 1 }
 0x526   :  { %939 = vsyncpa [#allocation6], 1 }
 0x527   :  { %941 = vsyncpa [#allocation6 + $0x1], 1 }
 0x528   :  { %942 = vsyncpa [#allocation9], 1 }
 0x529   :  { %944 = vsyncpa [#allocation9 + $0x1], 1 }
 0x52a   :  { %945 = vsyncpa [#allocation12], 1 }
 0x52b   :  { %947 = vsyncpa [#allocation12 + $0x1], 1 }
 0x52c   :  { %948 = vsyncpa [#allocation4], 1 }
 0x52d   :  { %950 = vsyncpa [#allocation4 + $0x1], 1 }
 0x52e   :  { %951 = vsyncpa [#allocation16], 1 }
 0x52f   :  { %953 = vsyncpa [#allocation16 + $0x1], 1 }

</bundles_post_ra>
